<compile_context>
chip_gen: v7x
topology: tpu7x:2x2x1
jax: 0.10.0
libtpu: 0.0.40
codegen_flags: <defaults>
</compile_context>

<pallas_src>
import math
import functools

import jax
import jax.numpy as jnp
from jax.experimental import pallas as pl
from jax.experimental.pallas import tpu as pltpu


# Row indices inside the packed (NUM_VECS, d_model) bias / LayerNorm block.
(VEC_BQ1, VEC_BO1, VEC_BQ2, VEC_BO2, VEC_BFF2,
 VEC_LN1A, VEC_LN1B, VEC_LN2A, VEC_LN2B, VEC_LN3A, VEC_LN3B) = range(11)
NUM_VECS = 16  # padded to a sublane multiple


# ---------------------------------------------------------------------------
# helpers
# ---------------------------------------------------------------------------
def _layernorm(x, a, b, eps=1e-6):
    """Annotated-Transformer LayerNorm: a*(x-mean)/(std+eps)+b, unbiased std.
    Single reduction pass (E[x], E[x^2]); exact division (approx reciprocal is
    reserved for the softmax denominator per the correctness review)."""
    n = x.shape[-1]
    mean = jnp.mean(x, axis=-1, keepdims=True)
    msq = jnp.mean(x * x, axis=-1, keepdims=True)
    var = (msq - mean * mean) * (n / (n - 1))          # unbiased, as torch.std()
    std = jnp.sqrt(jnp.maximum(var, 0.0))
    return a * (x - mean) / (std + eps) + b


def _layernorm_host(x, a, b, eps=1e-6):
    """Host/XLA LayerNorm (identical math) used for the hoisted K/V precompute."""
    n = x.shape[-1]
    mean = jnp.mean(x, axis=-1, keepdims=True)
    var = jnp.sum((x - mean) ** 2, axis=-1, keepdims=True) / (n - 1)
    std = jnp.sqrt(var)
    return a * (x - mean) / (std + eps) + b


def _softmax(s):
    """Numerically-stable softmax along the last axis (f32); EUP approx reciprocal."""
    m = jnp.max(s, axis=-1, keepdims=True)
    p = jnp.exp(s - m)
    denom = jnp.sum(p, axis=-1, keepdims=True)
    return p * pl.reciprocal(denom, approx=True)


# ---------------------------------------------------------------------------
# fused decoder-layer kernel: grid = (batch, query_tile), both axes parallel
# ---------------------------------------------------------------------------
def decoder_layer_kernel(x_ref, tgt_bias_ref, src_bias_ref,
                         k1_ref, v1_ref, k2_ref, v2_ref,
                         wq1_ref, wo1_ref, wq2_ref, wo2_ref,
                         w1_ref, w2_ref, vecs_ref, b1_ref,
                         out_ref, *, n_heads):
    tq, D = x_ref.shape
    dk = D // n_heads
    scale = 1.0 / math.sqrt(dk)
    bf16, f32 = jnp.bfloat16, jnp.float32

    vecs = vecs_ref[...]                        # (NUM_VECS, D) f32

    def vrow(i):                                # (1, D) bias / LN row
        return vecs[i:i + 1, :]

    x_t = x_ref[...]                            # (TQ, D) f32
    tgt_bias = tgt_bias_ref[...].astype(f32)    # (TQ, S_t) additive bias
    src_bias = src_bias_ref[...].astype(f32)    # (1,  S_s) additive bias

    def attend(x_norm, wq_ref, bq_row, k, v, bias, wo_ref, bo_row):
        """Head-batched MHA on one query tile. k/v: (H, S, dk) bf16 (precomputed)."""
        q = jnp.dot(x_norm.astype(bf16), wq_ref[...], preferred_element_type=f32) + bq_row
        q = q * scale                                        # fold 1/sqrt(dk) into Q
        qh = jnp.swapaxes(q.reshape(tq, n_heads, dk), 0, 1).astype(bf16)   # (H, TQ, dk)
        s = jnp.einsum('htk,hsk->hts', qh, k, preferred_element_type=f32)
        s = s + bias[None, :, :]
        p = _softmax(s)
        ctx = jnp.einsum('hts,hsk->htk', p.astype(bf16), v, preferred_element_type=f32)
        ctx = jnp.swapaxes(ctx, 0, 1).reshape(tq, D)
        return jnp.dot(ctx.astype(bf16), wo_ref[...], preferred_element_type=f32) + bo_row

    # ---- sublayer 0: x + self_attn(LayerNorm(x), tgt_mask) ----
    ln1_t = _layernorm(x_t, vrow(VEC_LN1A), vrow(VEC_LN1B))
    attn1 = attend(ln1_t, wq1_ref, vrow(VEC_BQ1), k1_ref[...], v1_ref[...],
                   tgt_bias, wo1_ref, vrow(VEC_BO1))
    # TODO(synk): dropout in SublayerConnection / attention treated as identity (eval mode)
    x1 = x_t + attn1

    # ---- sublayer 1: x + src_attn(LayerNorm(x), memory, memory, src_mask) ----
    ln2_t = _layernorm(x1, vrow(VEC_LN2A), vrow(VEC_LN2B))
    attn2 = attend(ln2_t, wq2_ref, vrow(VEC_BQ2), k2_ref[...], v2_ref[...],
                   src_bias, wo2_ref, vrow(VEC_BO2))
    x2 = x1 + attn2

    # ---- sublayer 2: x + feed_forward(LayerNorm(x)) ----
    ln3_t = _layernorm(x2, vrow(VEC_LN3A), vrow(VEC_LN3B))
    h1 = jnp.dot(ln3_t.astype(jnp.bfloat16), w1_ref[...], preferred_element_type=f32) + b1_ref[...]
    h1 = jnp.maximum(h1, 0.0)                                # ReLU
    ff = jnp.dot(h1.astype(jnp.bfloat16), w2_ref[...], preferred_element_type=f32) + vrow(VEC_BFF2)

    out_ref[...] = (x2 + ff).astype(out_ref.dtype)


# ---------------------------------------------------------------------------
# wrapper
# ---------------------------------------------------------------------------
def decoder_layer(x, memory, src_mask, tgt_mask, params, *, n_heads, tq=None):
    """x: (B, S_t, D) f32; memory: (B, S_s, D) f32;
       src_mask: (B, 1, S_s) (1=keep); tgt_mask: (B, S_t, S_t) (1=keep)."""
    B, S_t, D = x.shape
    _, S_s, _ = memory.shape
    d_ff = params["w1"].shape[1]
    dk = D // n_heads
    if tq is None:
        tq = min(S_t, 128)        # 256 is better on v6e/v7x for large S_t; 128 is safe everywhere
    assert S_t % tq == 0 and D % n_heads == 0
    n_t = S_t // tq
    bf16, f32 = jnp.bfloat16, jnp.float32

    # ---- hoisted precompute (plain XLA): head-batched bf16 K/V for both attentions ----
    def w_h(name):    # (D, D) -> (D, H, dk) bf16
        return params[name].astype(bf16).reshape(D, n_heads, dk)

    def b_h(name):    # (D,) -> (1, H, 1, dk) f32
        return params[name].astype(f32).reshape(1, n_heads, 1, dk)

    ln1_x = _layernorm_host(x.astype(f32),
                            params["ln1_a"].astype(f32), params["ln1_b"].astype(f32))
    ln1_bf = ln1_x.astype(bf16)
    mem_bf = memory.astype(bf16)       # dots consume bf16 anyway; halves memory traffic

    def proj(inp, wname, bname):       # -> (B, H, S, dk) bf16
        out = jnp.einsum('bsd,dhk->bhsk', inp, w_h(wname),
                         preferred_element_type=f32) + b_h(bname)
        return out.astype(bf16)

    k1 = proj(ln1_bf, "wk1", "bk1")    # self-attn K/V from LayerNorm(x)
    v1 = proj(ln1_bf, "wv1", "bv1")
    k2 = proj(mem_bf, "wk2", "bk2")    # cross-attn K/V from raw encoder memory
    v2 = proj(mem_bf, "wv2", "bv2")

    # masks -> additive bf16 biases (no per-tile f32 mask DMA, no in-kernel compare)
    tgt_bias = jnp.where(tgt_mask == 0.0, -1e9, 0.0).astype(bf16)   # (B, S_t, S_t)
    src_bias = jnp.where(src_mask == 0.0, -1e9, 0.0).astype(bf16)   # (B, 1,   S_s)

    # pack the remaining (d_model,) bias / LayerNorm vectors into one block
    vec_rows = [params["bq1"], params["bo1"], params["bq2"], params["bo2"],
                params["b2"],
                params["ln1_a"], params["ln1_b"],
                params["ln2_a"], params["ln2_b"],
                params["ln3_a"], params["ln3_b"]]
    vec_rows = [v.astype(f32) for v in vec_rows]
    vec_rows += [jnp.zeros((D,), f32)] * (NUM_VECS - len(vec_rows))
    vecs = jnp.stack(vec_rows, axis=0)                               # (16, D)
    b1 = params["b1"].astype(f32).reshape(1, d_ff)

    # kernel-resident weights (bf16): only Q / output projections + FFN remain
    wq1, wo1 = params["wq1"].astype(bf16), params["wo1"].astype(bf16)
    wq2, wo2 = params["wq2"].astype(bf16), params["wo2"].astype(bf16)
    w1, w2 = params["w1"].astype(bf16), params["w2"].astype(bf16)

    const2d = lambda shape: pl.BlockSpec(shape, lambda b, t: (0, 0))
    kv_spec = lambda s: pl.BlockSpec((None, n_heads, s, dk), lambda b, t: (b, 0, 0, 0))

    in_specs = [
        pl.BlockSpec((None, tq, D), lambda b, t: (b, t, 0)),     # x query tile
        pl.BlockSpec((None, tq, S_t), lambda b, t: (b, t, 0)),   # tgt additive bias tile
        pl.BlockSpec((None, 1, S_s), lambda b, t: (b, 0, 0)),    # src additive bias
        kv_spec(S_t), kv_spec(S_t),                              # self-attn K, V
        kv_spec(S_s), kv_spec(S_s),                              # cross-attn K, V
        const2d((D, D)), const2d((D, D)),                        # Wq1, Wo1
        const2d((D, D)), const2d((D, D)),                        # Wq2, Wo2
        const2d((D, d_ff)), const2d((d_ff, D)),                  # FFN W1, W2
        const2d((NUM_VECS, D)),                                  # packed biases / LN params
        const2d((1, d_ff)),                                      # FFN bias 1
    ]

    kernel = functools.partial(decoder_layer_kernel, n_heads=n_heads)

    # generation-aware VMEM limit (≈48 MiB on v7x, ≈96 MiB on v5e/v6e), safe fallback
    try:
        cap = int(pltpu.get_tpu_info().vmem_capacity_bytes)
        vmem_limit = max(min(cap * 3 // 4, 100 * 1024 * 1024), 32 * 1024 * 1024)
    except Exception:
        vmem_limit = 48 * 1024 * 1024

    return pl.pallas_call(
        kernel,
        out_shape=jax.ShapeDtypeStruct((B, S_t, D), x.dtype),
        grid_spec=pltpu.PrefetchScalarGridSpec(
            num_scalar_prefetch=0,
            grid=(B, n_t),
            in_specs=in_specs,
            out_specs=pl.BlockSpec((None, tq, D), lambda b, t: (b, t, 0)),
        ),
        compiler_params=pltpu.CompilerParams(
            dimension_semantics=("parallel", "parallel"),   # no cross-tile dependency left
            vmem_limit_bytes=vmem_limit),
    )(x, tgt_bias, src_bias, k1, v1, k2, v2,
      wq1, wo1, wq2, wo2, w1, w2, vecs, b1)


# ---------------------------------------------------------------------------
# deterministic parameter init + demo
# ---------------------------------------------------------------------------
def make_params(key, d_model, d_ff):
    ks = jax.random.split(key, 10)
    s = 0.1
    w = lambda k, shape: (s * jax.random.normal(k, shape, jnp.float32)).astype(jnp.bfloat16)
    zd = lambda: jnp.zeros((d_model,), jnp.float32)
    return {
        "wq1": w(ks[0], (d_model, d_model)), "bq1": zd(),
        "wk1": w(ks[1], (d_model, d_model)), "bk1": zd(),
        "wv1": w(ks[2], (d_model, d_model)), "bv1": zd(),
        "wo1": w(ks[3], (d_model, d_model)), "bo1": zd(),
        "wq2": w(ks[4], (d_model, d_model)), "bq2": zd(),
        "wk2": w(ks[5], (d_model, d_model)), "bk2": zd(),
        "wv2": w(ks[6], (d_model, d_model)), "bv2": zd(),
        "wo2": w(ks[7], (d_model, d_model)), "bo2": zd(),
        "w1": w(ks[8], (d_model, d_ff)), "b1": 0.01 * jnp.ones((d_ff,), jnp.float32),
        "w2": w(ks[9], (d_ff, d_model)), "b2": 0.01 * jnp.ones((d_model,), jnp.float32),
        "ln1_a": jnp.ones((d_model,), jnp.float32), "ln1_b": zd(),
        "ln2_a": jnp.ones((d_model,), jnp.float32), "ln2_b": zd(),
        "ln3_a": jnp.ones((d_model,), jnp.float32), "ln3_b": zd(),
    }


if __name__ == "__main__":
    B, S_T, S_S, D, H, D_FF, TQ = 2, 16, 8, 32, 4, 64, 8

    key = jax.random.PRNGKey(0)
    k_x, k_m, k_p = jax.random.split(key, 3)

    x = jax.random.normal(k_x, (B, S_T, D), jnp.float32)
    memory = jax.random.normal(k_m, (B, S_S, D), jnp.float32)

    # src_mask: (B, 1, S_S) padding mask over encoder memory
    src_lens = jnp.array([8, 5], jnp.int32)
    src_mask = (jnp.arange(S_S)[None, :] < src_lens[:, None]).astype(jnp.float32)[:, None, :]

    # tgt_mask: (B, S_T, S_T) = causal (subsequent) mask AND target padding mask
    tgt_lens = jnp.array([16, 11], jnp.int32)
    causal = jnp.tril(jnp.ones((S_T, S_T), jnp.float32))
    tgt_pad = (jnp.arange(S_T)[None, :] < tgt_lens[:, None]).astype(jnp.float32)   # (B, S_T)
    tgt_mask = causal[None, :, :] * tgt_pad[:, None, :]

    params = make_params(k_p, D, D_FF)

    out = decoder_layer(x, memory, src_mask, tgt_mask, params, n_heads=H, tq=TQ)
    jax.block_until_ready(out)
    assert out.shape == (B, S_T, D)
    assert bool(jnp.all(jnp.isfinite(out)))
    print("KERNEL_OK")
</pallas_src>

<mosaic_0001>
module attributes {stable_mosaic.version = 11 : i64} {
  func.func @decoder_layer_kernel(%arg0: i32, %arg1: i32, %arg2: memref<1x8x32xf32, #tpu.memory_space<vmem>>, %arg3: memref<1x8x16xbf16, #tpu.memory_space<vmem>>, %arg4: memref<1x1x8xbf16, #tpu.memory_space<vmem>>, %arg5: memref<1x4x16x8xbf16, #tpu.memory_space<vmem>>, %arg6: memref<1x4x16x8xbf16, #tpu.memory_space<vmem>>, %arg7: memref<1x4x8x8xbf16, #tpu.memory_space<vmem>>, %arg8: memref<1x4x8x8xbf16, #tpu.memory_space<vmem>>, %arg9: memref<32x32xbf16, #tpu.memory_space<vmem>>, %arg10: memref<32x32xbf16, #tpu.memory_space<vmem>>, %arg11: memref<32x32xbf16, #tpu.memory_space<vmem>>, %arg12: memref<32x32xbf16, #tpu.memory_space<vmem>>, %arg13: memref<32x64xbf16, #tpu.memory_space<vmem>>, %arg14: memref<64x32xbf16, #tpu.memory_space<vmem>>, %arg15: memref<16x32xf32, #tpu.memory_space<vmem>>, %arg16: memref<1x64xf32, #tpu.memory_space<vmem>>, %arg17: memref<1x8x32xf32, #tpu.memory_space<vmem>>) attributes {dimension_semantics = [#tpu.dimension_semantics<parallel>, #tpu.dimension_semantics<parallel>], iteration_bounds = array<i64: 2, 2>, scalar_prefetch = 0 : i64, scratch_operands = 0 : i64, tpu.core_type = #tpu.core_type<tc>, window_params = [{transform_indices = @transform_0, window_bounds = array<i64: 1, 8, 32>}, {transform_indices = @transform_1, window_bounds = array<i64: 1, 8, 16>}, {transform_indices = @transform_2, window_bounds = array<i64: 1, 1, 8>}, {transform_indices = @transform_3, window_bounds = array<i64: 1, 4, 16, 8>}, {transform_indices = @transform_4, window_bounds = array<i64: 1, 4, 16, 8>}, {transform_indices = @transform_5, window_bounds = array<i64: 1, 4, 8, 8>}, {transform_indices = @transform_6, window_bounds = array<i64: 1, 4, 8, 8>}, {pipeline_mode = #tpu.pipeline_mode<synchronous>, transform_indices = @transform_7, window_bounds = array<i64: 32, 32>}, {pipeline_mode = #tpu.pipeline_mode<synchronous>, transform_indices = @transform_8, window_bounds = array<i64: 32, 32>}, {pipeline_mode = #tpu.pipeline_mode<synchronous>, transform_indices = @transform_9, window_bounds = array<i64: 32, 32>}, {pipeline_mode = #tpu.pipeline_mode<synchronous>, transform_indices = @transform_10, window_bounds = array<i64: 32, 32>}, {pipeline_mode = #tpu.pipeline_mode<synchronous>, transform_indices = @transform_11, window_bounds = array<i64: 32, 64>}, {pipeline_mode = #tpu.pipeline_mode<synchronous>, transform_indices = @transform_12, window_bounds = array<i64: 64, 32>}, {pipeline_mode = #tpu.pipeline_mode<synchronous>, transform_indices = @transform_13, window_bounds = array<i64: 16, 32>}, {pipeline_mode = #tpu.pipeline_mode<synchronous>, transform_indices = @transform_14, window_bounds = array<i64: 1, 64>}, {transform_indices = @transform_15, window_bounds = array<i64: 1, 8, 32>}]} {
    %c0 = arith.constant 0 : index
    %c0_0 = arith.constant 0 : index
    %0 = vector.load %arg15[%c0, %c0_0] : memref<16x32xf32, #tpu.memory_space<vmem>>, vector<16x32xf32>
    %c0_1 = arith.constant 0 : index
    %c0_2 = arith.constant 0 : index
    %c0_3 = arith.constant 0 : index
    %1 = vector.load %arg2[%c0_1, %c0_2, %c0_3] : memref<1x8x32xf32, #tpu.memory_space<vmem>>, vector<1x8x32xf32>
    %2 = vector.shape_cast %1 : vector<1x8x32xf32> to vector<8x32xf32>
    %c0_4 = arith.constant 0 : index
    %c0_5 = arith.constant 0 : index
    %c0_6 = arith.constant 0 : index
    %3 = vector.load %arg3[%c0_4, %c0_5, %c0_6] : memref<1x8x16xbf16, #tpu.memory_space<vmem>>, vector<1x8x16xbf16>
    %4 = vector.shape_cast %3 : vector<1x8x16xbf16> to vector<8x16xbf16>
    %5 = arith.extf %4 : vector<8x16xbf16> to vector<8x16xf32>
    %c0_7 = arith.constant 0 : index
    %c0_8 = arith.constant 0 : index
    %c0_9 = arith.constant 0 : index
    %6 = vector.load %arg4[%c0_7, %c0_8, %c0_9] : memref<1x1x8xbf16, #tpu.memory_space<vmem>>, vector<1x1x8xbf16>
    %7 = vector.shape_cast %6 : vector<1x1x8xbf16> to vector<1x8xbf16>
    %8 = arith.extf %7 : vector<1x8xbf16> to vector<1x8xf32>
    %9 = vector.extract_strided_slice %0 {offsets = [5, 0], sizes = [1, 32], strides = [1, 1]} : vector<16x32xf32> to vector<1x32xf32>
    %10 = vector.extract_strided_slice %0 {offsets = [6, 0], sizes = [1, 32], strides = [1, 1]} : vector<16x32xf32> to vector<1x32xf32>
    %cst = arith.constant dense<0.000000e+00> : vector<8xf32>
    %11 = vector.multi_reduction <add>, %2, %cst [1] : vector<8x32xf32> to vector<8xf32>
    %12 = vector.shape_cast %11 : vector<8xf32> to vector<8x1xf32>
    %cst_10 = arith.constant 3.200000e+01 : f32
    %13 = vector.broadcast %cst_10 : f32 to vector<8x1xf32>
    %14 = arith.divf %12, %13 : vector<8x1xf32>
    %15 = arith.mulf %2, %2 : vector<8x32xf32>
    %cst_11 = arith.constant dense<0.000000e+00> : vector<8xf32>
    %16 = vector.multi_reduction <add>, %15, %cst_11 [1] : vector<8x32xf32> to vector<8xf32>
    %17 = vector.shape_cast %16 : vector<8xf32> to vector<8x1xf32>
    %cst_12 = arith.constant 3.200000e+01 : f32
    %18 = vector.broadcast %cst_12 : f32 to vector<8x1xf32>
    %19 = arith.divf %17, %18 : vector<8x1xf32>
    %20 = arith.mulf %14, %14 : vector<8x1xf32>
    %21 = arith.subf %19, %20 : vector<8x1xf32>
    %cst_13 = arith.constant 1.03225803 : f32
    %22 = vector.broadcast %cst_13 : f32 to vector<8x1xf32>
    %23 = arith.mulf %21, %22 : vector<8x1xf32>
    %cst_14 = arith.constant 0.000000e+00 : f32
    %24 = vector.broadcast %cst_14 : f32 to vector<8x1xf32>
    %25 = arith.maximumf %23, %24 : vector<8x1xf32>
    %26 = math.sqrt %25 : vector<8x1xf32>
    %27 = vector.broadcast %14 : vector<8x1xf32> to vector<8x32xf32>
    %28 = arith.subf %2, %27 : vector<8x32xf32>
    %29 = vector.broadcast %9 : vector<1x32xf32> to vector<8x32xf32>
    %30 = arith.mulf %29, %28 : vector<8x32xf32>
    %cst_15 = arith.constant 9.99999997E-7 : f32
    %31 = vector.broadcast %cst_15 : f32 to vector<8x1xf32>
    %32 = arith.addf %26, %31 : vector<8x1xf32>
    %33 = vector.broadcast %32 : vector<8x1xf32> to vector<8x32xf32>
    %34 = arith.divf %30, %33 : vector<8x32xf32>
    %35 = vector.broadcast %10 : vector<1x32xf32> to vector<8x32xf32>
    %36 = arith.addf %34, %35 : vector<8x32xf32>
    %37 = vector.extract_strided_slice %0 {offsets = [0, 0], sizes = [1, 32], strides = [1, 1]} : vector<16x32xf32> to vector<1x32xf32>
    %c0_16 = arith.constant 0 : index
    %c0_17 = arith.constant 0 : index
    %c0_18 = arith.constant 0 : index
    %c0_19 = arith.constant 0 : index
    %38 = vector.load %arg5[%c0_16, %c0_17, %c0_18, %c0_19] : memref<1x4x16x8xbf16, #tpu.memory_space<vmem>>, vector<1x4x16x8xbf16>
    %39 = vector.shape_cast %38 : vector<1x4x16x8xbf16> to vector<4x16x8xbf16>
    %c0_20 = arith.constant 0 : index
    %c0_21 = arith.constant 0 : index
    %c0_22 = arith.constant 0 : index
    %c0_23 = arith.constant 0 : index
    %40 = vector.load %arg6[%c0_20, %c0_21, %c0_22, %c0_23] : memref<1x4x16x8xbf16, #tpu.memory_space<vmem>>, vector<1x4x16x8xbf16>
    %41 = vector.shape_cast %40 : vector<1x4x16x8xbf16> to vector<4x16x8xbf16>
    %42 = vector.extract_strided_slice %0 {offsets = [1, 0], sizes = [1, 32], strides = [1, 1]} : vector<16x32xf32> to vector<1x32xf32>
    %43 = arith.truncf %36 : vector<8x32xf32> to vector<8x32xbf16>
    %c0_24 = arith.constant 0 : index
    %c0_25 = arith.constant 0 : index
    %44 = vector.load %arg9[%c0_24, %c0_25] : memref<32x32xbf16, #tpu.memory_space<vmem>>, vector<32x32xbf16>
    %cst_26 = arith.constant dense<0.000000e+00> : vector<8x32xf32>
    %45 = tpu.matmul %43, %44, %cst_26 {dimension_numbers = #tpu.dot_dimension_numbers<[1], [0], [0], [1], [0, 0, 1, 1], [], []>} : vector<8x32xbf16>, vector<32x32xbf16>, vector<8x32xf32> -> vector<8x32xf32>
    %46 = vector.broadcast %37 : vector<1x32xf32> to vector<8x32xf32>
    %47 = arith.addf %45, %46 : vector<8x32xf32>
    %cst_27 = arith.constant 0.353553385 : f32
    %48 = vector.broadcast %cst_27 : f32 to vector<8x32xf32>
    %49 = arith.mulf %47, %48 : vector<8x32xf32>
    %50 = vector.shape_cast %49 : vector<8x32xf32> to vector<8x4x8xf32>
    %51 = tpu.transpose %50, [1, 0, 2] : vector<8x4x8xf32> -> vector<4x8x8xf32>
    %52 = arith.truncf %51 : vector<4x8x8xf32> to vector<4x8x8xbf16>
    "tpu.trace_start"() <{level = 10 : i32, message = "htk,hsk->hts"}> : () -> ()
    %cst_28 = arith.constant dense<0.000000e+00> : vector<4x8x16xf32>
    %53 = tpu.matmul %52, %39, %cst_28 {dimension_numbers = #tpu.dot_dimension_numbers<[2], [2], [1], [1], [0, 0, 0, 1, 1, 1], [0], [0]>} : vector<4x8x8xbf16>, vector<4x16x8xbf16>, vector<4x8x16xf32> -> vector<4x8x16xf32>
    "tpu.trace_stop"() : () -> ()
    %54 = vector.shape_cast %5 : vector<8x16xf32> to vector<1x8x16xf32>
    %55 = vector.broadcast %54 : vector<1x8x16xf32> to vector<4x8x16xf32>
    %56 = arith.addf %53, %55 : vector<4x8x16xf32>
    %cst_29 = arith.constant dense<0xFF800000> : vector<4x8xf32>
    %57 = vector.multi_reduction <maximumf>, %56, %cst_29 [2] : vector<4x8x16xf32> to vector<4x8xf32>
    %58 = vector.shape_cast %57 : vector<4x8xf32> to vector<4x8x1xf32>
    %59 = vector.broadcast %58 : vector<4x8x1xf32> to vector<4x8x16xf32>
    %60 = arith.subf %56, %59 : vector<4x8x16xf32>
    %61 = math.exp %60 : vector<4x8x16xf32>
    %cst_30 = arith.constant dense<0.000000e+00> : vector<4x8xf32>
    %62 = vector.multi_reduction <add>, %61, %cst_30 [2] : vector<4x8x16xf32> to vector<4x8xf32>
    %63 = vector.shape_cast %62 : vector<4x8xf32> to vector<4x8x1xf32>
    %64 = tpu.reciprocal %63 {approx = true} : vector<4x8x1xf32> -> vector<4x8x1xf32>
    %65 = vector.broadcast %64 : vector<4x8x1xf32> to vector<4x8x16xf32>
    %66 = arith.mulf %61, %65 : vector<4x8x16xf32>
    %67 = arith.truncf %66 : vector<4x8x16xf32> to vector<4x8x16xbf16>
    "tpu.trace_start"() <{level = 10 : i32, message = "hts,hsk->htk"}> : () -> ()
    %cst_31 = arith.constant dense<0.000000e+00> : vector<4x8x8xf32>
    %68 = tpu.matmul %67, %41, %cst_31 {dimension_numbers = #tpu.dot_dimension_numbers<[2], [1], [1], [2], [0, 0, 0, 1, 1, 2], [0], [0]>} : vector<4x8x16xbf16>, vector<4x16x8xbf16>, vector<4x8x8xf32> -> vector<4x8x8xf32>
    "tpu.trace_stop"() : () -> ()
    %69 = tpu.transpose %68, [1, 0, 2] : vector<4x8x8xf32> -> vector<8x4x8xf32>
    %70 = vector.shape_cast %69 : vector<8x4x8xf32> to vector<8x32xf32>
    %71 = arith.truncf %70 : vector<8x32xf32> to vector<8x32xbf16>
    %c0_32 = arith.constant 0 : index
    %c0_33 = arith.constant 0 : index
    %72 = vector.load %arg10[%c0_32, %c0_33] : memref<32x32xbf16, #tpu.memory_space<vmem>>, vector<32x32xbf16>
    %cst_34 = arith.constant dense<0.000000e+00> : vector<8x32xf32>
    %73 = tpu.matmul %71, %72, %cst_34 {dimension_numbers = #tpu.dot_dimension_numbers<[1], [0], [0], [1], [0, 0, 1, 1], [], []>} : vector<8x32xbf16>, vector<32x32xbf16>, vector<8x32xf32> -> vector<8x32xf32>
    %74 = vector.broadcast %42 : vector<1x32xf32> to vector<8x32xf32>
    %75 = arith.addf %73, %74 : vector<8x32xf32>
    %76 = arith.addf %2, %75 : vector<8x32xf32>
    %77 = vector.extract_strided_slice %0 {offsets = [7, 0], sizes = [1, 32], strides = [1, 1]} : vector<16x32xf32> to vector<1x32xf32>
    %78 = vector.extract_strided_slice %0 {offsets = [8, 0], sizes = [1, 32], strides = [1, 1]} : vector<16x32xf32> to vector<1x32xf32>
    %cst_35 = arith.constant dense<0.000000e+00> : vector<8xf32>
    %79 = vector.multi_reduction <add>, %76, %cst_35 [1] : vector<8x32xf32> to vector<8xf32>
    %80 = vector.shape_cast %79 : vector<8xf32> to vector<8x1xf32>
    %cst_36 = arith.constant 3.200000e+01 : f32
    %81 = vector.broadcast %cst_36 : f32 to vector<8x1xf32>
    %82 = arith.divf %80, %81 : vector<8x1xf32>
    %83 = arith.mulf %76, %76 : vector<8x32xf32>
    %cst_37 = arith.constant dense<0.000000e+00> : vector<8xf32>
    %84 = vector.multi_reduction <add>, %83, %cst_37 [1] : vector<8x32xf32> to vector<8xf32>
    %85 = vector.shape_cast %84 : vector<8xf32> to vector<8x1xf32>
    %cst_38 = arith.constant 3.200000e+01 : f32
    %86 = vector.broadcast %cst_38 : f32 to vector<8x1xf32>
    %87 = arith.divf %85, %86 : vector<8x1xf32>
    %88 = arith.mulf %82, %82 : vector<8x1xf32>
    %89 = arith.subf %87, %88 : vector<8x1xf32>
    %cst_39 = arith.constant 1.03225803 : f32
    %90 = vector.broadcast %cst_39 : f32 to vector<8x1xf32>
    %91 = arith.mulf %89, %90 : vector<8x1xf32>
    %cst_40 = arith.constant 0.000000e+00 : f32
    %92 = vector.broadcast %cst_40 : f32 to vector<8x1xf32>
    %93 = arith.maximumf %91, %92 : vector<8x1xf32>
    %94 = math.sqrt %93 : vector<8x1xf32>
    %95 = vector.broadcast %82 : vector<8x1xf32> to vector<8x32xf32>
    %96 = arith.subf %76, %95 : vector<8x32xf32>
    %97 = vector.broadcast %77 : vector<1x32xf32> to vector<8x32xf32>
    %98 = arith.mulf %97, %96 : vector<8x32xf32>
    %cst_41 = arith.constant 9.99999997E-7 : f32
    %99 = vector.broadcast %cst_41 : f32 to vector<8x1xf32>
    %100 = arith.addf %94, %99 : vector<8x1xf32>
    %101 = vector.broadcast %100 : vector<8x1xf32> to vector<8x32xf32>
    %102 = arith.divf %98, %101 : vector<8x32xf32>
    %103 = vector.broadcast %78 : vector<1x32xf32> to vector<8x32xf32>
    %104 = arith.addf %102, %103 : vector<8x32xf32>
    %105 = vector.extract_strided_slice %0 {offsets = [2, 0], sizes = [1, 32], strides = [1, 1]} : vector<16x32xf32> to vector<1x32xf32>
    %c0_42 = arith.constant 0 : index
    %c0_43 = arith.constant 0 : index
    %c0_44 = arith.constant 0 : index
    %c0_45 = arith.constant 0 : index
    %106 = vector.load %arg7[%c0_42, %c0_43, %c0_44, %c0_45] : memref<1x4x8x8xbf16, #tpu.memory_space<vmem>>, vector<1x4x8x8xbf16>
    %107 = vector.shape_cast %106 : vector<1x4x8x8xbf16> to vector<4x8x8xbf16>
    %c0_46 = arith.constant 0 : index
    %c0_47 = arith.constant 0 : index
    %c0_48 = arith.constant 0 : index
    %c0_49 = arith.constant 0 : index
    %108 = vector.load %arg8[%c0_46, %c0_47, %c0_48, %c0_49] : memref<1x4x8x8xbf16, #tpu.memory_space<vmem>>, vector<1x4x8x8xbf16>
    %109 = vector.shape_cast %108 : vector<1x4x8x8xbf16> to vector<4x8x8xbf16>
    %110 = vector.extract_strided_slice %0 {offsets = [3, 0], sizes = [1, 32], strides = [1, 1]} : vector<16x32xf32> to vector<1x32xf32>
    %111 = arith.truncf %104 : vector<8x32xf32> to vector<8x32xbf16>
    %c0_50 = arith.constant 0 : index
    %c0_51 = arith.constant 0 : index
    %112 = vector.load %arg11[%c0_50, %c0_51] : memref<32x32xbf16, #tpu.memory_space<vmem>>, vector<32x32xbf16>
    %cst_52 = arith.constant dense<0.000000e+00> : vector<8x32xf32>
    %113 = tpu.matmul %111, %112, %cst_52 {dimension_numbers = #tpu.dot_dimension_numbers<[1], [0], [0], [1], [0, 0, 1, 1], [], []>} : vector<8x32xbf16>, vector<32x32xbf16>, vector<8x32xf32> -> vector<8x32xf32>
    %114 = vector.broadcast %105 : vector<1x32xf32> to vector<8x32xf32>
    %115 = arith.addf %113, %114 : vector<8x32xf32>
    %cst_53 = arith.constant 0.353553385 : f32
    %116 = vector.broadcast %cst_53 : f32 to vector<8x32xf32>
    %117 = arith.mulf %115, %116 : vector<8x32xf32>
    %118 = vector.shape_cast %117 : vector<8x32xf32> to vector<8x4x8xf32>
    %119 = tpu.transpose %118, [1, 0, 2] : vector<8x4x8xf32> -> vector<4x8x8xf32>
    %120 = arith.truncf %119 : vector<4x8x8xf32> to vector<4x8x8xbf16>
    "tpu.trace_start"() <{level = 10 : i32, message = "htk,hsk->hts"}> : () -> ()
    %cst_54 = arith.constant dense<0.000000e+00> : vector<4x8x8xf32>
    %121 = tpu.matmul %120, %107, %cst_54 {dimension_numbers = #tpu.dot_dimension_numbers<[2], [2], [1], [1], [0, 0, 0, 1, 1, 1], [0], [0]>} : vector<4x8x8xbf16>, vector<4x8x8xbf16>, vector<4x8x8xf32> -> vector<4x8x8xf32>
    "tpu.trace_stop"() : () -> ()
    %122 = vector.shape_cast %8 : vector<1x8xf32> to vector<1x1x8xf32>
    %123 = vector.broadcast %122 : vector<1x1x8xf32> to vector<4x8x8xf32>
    %124 = arith.addf %121, %123 : vector<4x8x8xf32>
    %cst_55 = arith.constant dense<0xFF800000> : vector<4x8xf32>
    %125 = vector.multi_reduction <maximumf>, %124, %cst_55 [2] : vector<4x8x8xf32> to vector<4x8xf32>
    %126 = vector.shape_cast %125 : vector<4x8xf32> to vector<4x8x1xf32>
    %127 = vector.broadcast %126 : vector<4x8x1xf32> to vector<4x8x8xf32>
    %128 = arith.subf %124, %127 : vector<4x8x8xf32>
    %129 = math.exp %128 : vector<4x8x8xf32>
    %cst_56 = arith.constant dense<0.000000e+00> : vector<4x8xf32>
    %130 = vector.multi_reduction <add>, %129, %cst_56 [2] : vector<4x8x8xf32> to vector<4x8xf32>
    %131 = vector.shape_cast %130 : vector<4x8xf32> to vector<4x8x1xf32>
    %132 = tpu.reciprocal %131 {approx = true} : vector<4x8x1xf32> -> vector<4x8x1xf32>
    %133 = vector.broadcast %132 : vector<4x8x1xf32> to vector<4x8x8xf32>
    %134 = arith.mulf %129, %133 : vector<4x8x8xf32>
    %135 = arith.truncf %134 : vector<4x8x8xf32> to vector<4x8x8xbf16>
    "tpu.trace_start"() <{level = 10 : i32, message = "hts,hsk->htk"}> : () -> ()
    %cst_57 = arith.constant dense<0.000000e+00> : vector<4x8x8xf32>
    %136 = tpu.matmul %135, %109, %cst_57 {dimension_numbers = #tpu.dot_dimension_numbers<[2], [1], [1], [2], [0, 0, 0, 1, 1, 2], [0], [0]>} : vector<4x8x8xbf16>, vector<4x8x8xbf16>, vector<4x8x8xf32> -> vector<4x8x8xf32>
    "tpu.trace_stop"() : () -> ()
    %137 = tpu.transpose %136, [1, 0, 2] : vector<4x8x8xf32> -> vector<8x4x8xf32>
    %138 = vector.shape_cast %137 : vector<8x4x8xf32> to vector<8x32xf32>
    %139 = arith.truncf %138 : vector<8x32xf32> to vector<8x32xbf16>
    %c0_58 = arith.constant 0 : index
    %c0_59 = arith.constant 0 : index
    %140 = vector.load %arg12[%c0_58, %c0_59] : memref<32x32xbf16, #tpu.memory_space<vmem>>, vector<32x32xbf16>
    %cst_60 = arith.constant dense<0.000000e+00> : vector<8x32xf32>
    %141 = tpu.matmul %139, %140, %cst_60 {dimension_numbers = #tpu.dot_dimension_numbers<[1], [0], [0], [1], [0, 0, 1, 1], [], []>} : vector<8x32xbf16>, vector<32x32xbf16>, vector<8x32xf32> -> vector<8x32xf32>
    %142 = vector.broadcast %110 : vector<1x32xf32> to vector<8x32xf32>
    %143 = arith.addf %141, %142 : vector<8x32xf32>
    %144 = arith.addf %76, %143 : vector<8x32xf32>
    %145 = vector.extract_strided_slice %0 {offsets = [9, 0], sizes = [1, 32], strides = [1, 1]} : vector<16x32xf32> to vector<1x32xf32>
    %146 = vector.extract_strided_slice %0 {offsets = [10, 0], sizes = [1, 32], strides = [1, 1]} : vector<16x32xf32> to vector<1x32xf32>
    %cst_61 = arith.constant dense<0.000000e+00> : vector<8xf32>
    %147 = vector.multi_reduction <add>, %144, %cst_61 [1] : vector<8x32xf32> to vector<8xf32>
    %148 = vector.shape_cast %147 : vector<8xf32> to vector<8x1xf32>
    %cst_62 = arith.constant 3.200000e+01 : f32
    %149 = vector.broadcast %cst_62 : f32 to vector<8x1xf32>
    %150 = arith.divf %148, %149 : vector<8x1xf32>
    %151 = arith.mulf %144, %144 : vector<8x32xf32>
    %cst_63 = arith.constant dense<0.000000e+00> : vector<8xf32>
    %152 = vector.multi_reduction <add>, %151, %cst_63 [1] : vector<8x32xf32> to vector<8xf32>
    %153 = vector.shape_cast %152 : vector<8xf32> to vector<8x1xf32>
    %cst_64 = arith.constant 3.200000e+01 : f32
    %154 = vector.broadcast %cst_64 : f32 to vector<8x1xf32>
    %155 = arith.divf %153, %154 : vector<8x1xf32>
    %156 = arith.mulf %150, %150 : vector<8x1xf32>
    %157 = arith.subf %155, %156 : vector<8x1xf32>
    %cst_65 = arith.constant 1.03225803 : f32
    %158 = vector.broadcast %cst_65 : f32 to vector<8x1xf32>
    %159 = arith.mulf %157, %158 : vector<8x1xf32>
    %cst_66 = arith.constant 0.000000e+00 : f32
    %160 = vector.broadcast %cst_66 : f32 to vector<8x1xf32>
    %161 = arith.maximumf %159, %160 : vector<8x1xf32>
    %162 = math.sqrt %161 : vector<8x1xf32>
    %163 = vector.broadcast %150 : vector<8x1xf32> to vector<8x32xf32>
    %164 = arith.subf %144, %163 : vector<8x32xf32>
    %165 = vector.broadcast %145 : vector<1x32xf32> to vector<8x32xf32>
    %166 = arith.mulf %165, %164 : vector<8x32xf32>
    %cst_67 = arith.constant 9.99999997E-7 : f32
    %167 = vector.broadcast %cst_67 : f32 to vector<8x1xf32>
    %168 = arith.addf %162, %167 : vector<8x1xf32>
    %169 = vector.broadcast %168 : vector<8x1xf32> to vector<8x32xf32>
    %170 = arith.divf %166, %169 : vector<8x32xf32>
    %171 = vector.broadcast %146 : vector<1x32xf32> to vector<8x32xf32>
    %172 = arith.addf %170, %171 : vector<8x32xf32>
    %173 = arith.truncf %172 : vector<8x32xf32> to vector<8x32xbf16>
    %c0_68 = arith.constant 0 : index
    %c0_69 = arith.constant 0 : index
    %174 = vector.load %arg13[%c0_68, %c0_69] : memref<32x64xbf16, #tpu.memory_space<vmem>>, vector<32x64xbf16>
    %cst_70 = arith.constant dense<0.000000e+00> : vector<8x64xf32>
    %175 = tpu.matmul %173, %174, %cst_70 {dimension_numbers = #tpu.dot_dimension_numbers<[1], [0], [0], [1], [0, 0, 1, 1], [], []>} : vector<8x32xbf16>, vector<32x64xbf16>, vector<8x64xf32> -> vector<8x64xf32>
    %c0_71 = arith.constant 0 : index
    %c0_72 = arith.constant 0 : index
    %176 = vector.load %arg16[%c0_71, %c0_72] : memref<1x64xf32, #tpu.memory_space<vmem>>, vector<1x64xf32>
    %177 = vector.broadcast %176 : vector<1x64xf32> to vector<8x64xf32>
    %178 = arith.addf %175, %177 : vector<8x64xf32>
    %cst_73 = arith.constant 0.000000e+00 : f32
    %179 = vector.broadcast %cst_73 : f32 to vector<8x64xf32>
    %180 = arith.maximumf %178, %179 : vector<8x64xf32>
    %181 = arith.truncf %180 : vector<8x64xf32> to vector<8x64xbf16>
    %c0_74 = arith.constant 0 : index
    %c0_75 = arith.constant 0 : index
    %182 = vector.load %arg14[%c0_74, %c0_75] : memref<64x32xbf16, #tpu.memory_space<vmem>>, vector<64x32xbf16>
    %cst_76 = arith.constant dense<0.000000e+00> : vector<8x32xf32>
    %183 = tpu.matmul %181, %182, %cst_76 {dimension_numbers = #tpu.dot_dimension_numbers<[1], [0], [0], [1], [0, 0, 1, 1], [], []>} : vector<8x64xbf16>, vector<64x32xbf16>, vector<8x32xf32> -> vector<8x32xf32>
    %184 = vector.extract_strided_slice %0 {offsets = [4, 0], sizes = [1, 32], strides = [1, 1]} : vector<16x32xf32> to vector<1x32xf32>
    %185 = vector.broadcast %184 : vector<1x32xf32> to vector<8x32xf32>
    %186 = arith.addf %183, %185 : vector<8x32xf32>
    %187 = arith.addf %144, %186 : vector<8x32xf32>
    %c0_77 = arith.constant 0 : index
    %c0_78 = arith.constant 0 : index
    %c0_79 = arith.constant 0 : index
    %188 = vector.load %arg17[%c0_77, %c0_78, %c0_79] : memref<1x8x32xf32, #tpu.memory_space<vmem>>, vector<1x8x32xf32>
    %189 = vector.shape_cast %188 : vector<1x8x32xf32> to vector<8x32xf32>
    %190 = vector.shape_cast %187 : vector<8x32xf32> to vector<1x8x32xf32>
    tpu.vector_store %arg17[%c0_77, %c0_78, %c0_79], %190 {strides = array<i32>} : memref<1x8x32xf32, #tpu.memory_space<vmem>>, vector<1x8x32xf32>,
    return
  }
  func.func @transform_0(%arg0: i32, %arg1: i32) -> (i32, i32, i32) {
    %c0_i32 = arith.constant 0 : i32
    %c0_i32_0 = arith.constant 0 : i32
    return %arg0, %arg1, %c0_i32 : i32, i32, i32
  }
  func.func @transform_1(%arg0: i32, %arg1: i32) -> (i32, i32, i32) {
    %c0_i32 = arith.constant 0 : i32
    %c0_i32_0 = arith.constant 0 : i32
    return %arg0, %arg1, %c0_i32 : i32, i32, i32
  }
  func.func @transform_2(%arg0: i32, %arg1: i32) -> (i32, i32, i32) {
    %c0_i32 = arith.constant 0 : i32
    %c0_i32_0 = arith.constant 0 : i32
    %c0_i32_1 = arith.constant 0 : i32
    return %arg0, %c0_i32, %c0_i32_0 : i32, i32, i32
  }
  func.func @transform_3(%arg0: i32, %arg1: i32) -> (i32, i32, i32, i32) {
    %c0_i32 = arith.constant 0 : i32
    %c0_i32_0 = arith.constant 0 : i32
    %c0_i32_1 = arith.constant 0 : i32
    %c0_i32_2 = arith.constant 0 : i32
    return %arg0, %c0_i32, %c0_i32_0, %c0_i32_1 : i32, i32, i32, i32
  }
  func.func @transform_4(%arg0: i32, %arg1: i32) -> (i32, i32, i32, i32) {
    %c0_i32 = arith.constant 0 : i32
    %c0_i32_0 = arith.constant 0 : i32
    %c0_i32_1 = arith.constant 0 : i32
    %c0_i32_2 = arith.constant 0 : i32
    return %arg0, %c0_i32, %c0_i32_0, %c0_i32_1 : i32, i32, i32, i32
  }
  func.func @transform_5(%arg0: i32, %arg1: i32) -> (i32, i32, i32, i32) {
    %c0_i32 = arith.constant 0 : i32
    %c0_i32_0 = arith.constant 0 : i32
    %c0_i32_1 = arith.constant 0 : i32
    %c0_i32_2 = arith.constant 0 : i32
    return %arg0, %c0_i32, %c0_i32_0, %c0_i32_1 : i32, i32, i32, i32
  }
  func.func @transform_6(%arg0: i32, %arg1: i32) -> (i32, i32, i32, i32) {
    %c0_i32 = arith.constant 0 : i32
    %c0_i32_0 = arith.constant 0 : i32
    %c0_i32_1 = arith.constant 0 : i32
    %c0_i32_2 = arith.constant 0 : i32
    return %arg0, %c0_i32, %c0_i32_0, %c0_i32_1 : i32, i32, i32, i32
  }
  func.func @transform_7(%arg0: i32, %arg1: i32) -> (i32, i32) {
    %c0_i32 = arith.constant 0 : i32
    %c0_i32_0 = arith.constant 0 : i32
    %c0_i32_1 = arith.constant 0 : i32
    return %c0_i32, %c0_i32_0 : i32, i32
  }
  func.func @transform_8(%arg0: i32, %arg1: i32) -> (i32, i32) {
    %c0_i32 = arith.constant 0 : i32
    %c0_i32_0 = arith.constant 0 : i32
    %c0_i32_1 = arith.constant 0 : i32
    return %c0_i32, %c0_i32_0 : i32, i32
  }
  func.func @transform_9(%arg0: i32, %arg1: i32) -> (i32, i32) {
    %c0_i32 = arith.constant 0 : i32
    %c0_i32_0 = arith.constant 0 : i32
    %c0_i32_1 = arith.constant 0 : i32
    return %c0_i32, %c0_i32_0 : i32, i32
  }
  func.func @transform_10(%arg0: i32, %arg1: i32) -> (i32, i32) {
    %c0_i32 = arith.constant 0 : i32
    %c0_i32_0 = arith.constant 0 : i32
    %c0_i32_1 = arith.constant 0 : i32
    return %c0_i32, %c0_i32_0 : i32, i32
  }
  func.func @transform_11(%arg0: i32, %arg1: i32) -> (i32, i32) {
    %c0_i32 = arith.constant 0 : i32
    %c0_i32_0 = arith.constant 0 : i32
    %c0_i32_1 = arith.constant 0 : i32
    return %c0_i32, %c0_i32_0 : i32, i32
  }
  func.func @transform_12(%arg0: i32, %arg1: i32) -> (i32, i32) {
    %c0_i32 = arith.constant 0 : i32
    %c0_i32_0 = arith.constant 0 : i32
    %c0_i32_1 = arith.constant 0 : i32
    return %c0_i32, %c0_i32_0 : i32, i32
  }
  func.func @transform_13(%arg0: i32, %arg1: i32) -> (i32, i32) {
    %c0_i32 = arith.constant 0 : i32
    %c0_i32_0 = arith.constant 0 : i32
    %c0_i32_1 = arith.constant 0 : i32
    return %c0_i32, %c0_i32_0 : i32, i32
  }
  func.func @transform_14(%arg0: i32, %arg1: i32) -> (i32, i32) {
    %c0_i32 = arith.constant 0 : i32
    %c0_i32_0 = arith.constant 0 : i32
    %c0_i32_1 = arith.constant 0 : i32
    return %c0_i32, %c0_i32_0 : i32, i32
  }
  func.func @transform_15(%arg0: i32, %arg1: i32) -> (i32, i32, i32) {
    %c0_i32 = arith.constant 0 : i32
    %c0_i32_0 = arith.constant 0 : i32
    return %arg0, %arg1, %c0_i32 : i32, i32, i32
  }
}

</mosaic_0001>

<bundles_post_ra>
// kernel: tpu_custom_call.1
= control target key start
LH: loop header
LB: loop body
LE: loop exit
PB: predicated region body
PF: predicated region fallthrough
CT: control target
= control target key end

     0   :  { %s3964_s0 = inlined_call_operand.vmem [shape: f32[2,16,32], index: 0, kind: input, shape index: {}]   ;;  %s3965_s1 = inlined_call_operand.vmem [shape: bf16[2,16,16], index: 1, kind: input, shape index: {}]   ;;  %s3966_s2 = inlined_call_operand.vmem [shape: bf16[2,1,8], index: 2, kind: input, shape index: {}]   ;;  %s3967_s3 = inlined_call_operand.vmem [shape: bf16[2,4,16,8], index: 3, kind: input, shape index: {}]   ;;  %s3968_s4 = inlined_call_operand.vmem [shape: bf16[2,4,16,8], index: 4, kind: input, shape index: {}]   ;;  %s3969_s5 = inlined_call_operand.vmem [shape: bf16[2,4,8,8], index: 5, kind: input, shape index: {}]   ;;  %s3970_s6 = inlined_call_operand.vmem [shape: bf16[2,4,8,8], index: 6, kind: input, shape index: {}]   ;;  %s3971_s7 = inlined_call_operand.vmem [shape: bf16[32,32], index: 7, kind: input, shape index: {}]   ;;  %s3972_s8 = inlined_call_operand.vmem [shape: bf16[32,32], index: 8, kind: input, shape index: {}]   ;;  %s3973_s9 = inlined_call_operand.vmem [shape: bf16[32,32], index: 9, kind: input, shape index: {}]   ;;  %s3974_s10 = inlined_call_operand.vmem [shape: bf16[32,32], index: 10, kind: input, shape index: {}]   ;;  %s3975_s11 = inlined_call_operand.vmem [shape: bf16[32,64], index: 11, kind: input, shape index: {}]   ;;  %s3976_s12 = inlined_call_operand.vmem [shape: bf16[64,32], index: 12, kind: input, shape index: {}]   ;;  %s3977_s13 = inlined_call_operand.vmem [shape: f32[16,32], index: 13, kind: input, shape index: {}]   ;;  %s3978_s14 = inlined_call_operand.vmem [shape: f32[1,64], index: 14, kind: input, shape index: {}]   ;;  %s3979_s15 = inlined_call_operand.hbm [shape: f32[2,16,32], index: 15, kind: output, shape index: {}]  }
   0x1   :  { %3987 = sst [smem:[#allocation10_spill]] %s3964_s0 }
   0x2   :  { %3988 = sst [smem:[#allocation11_spill]] %s3971_s7 }
   0x3   :  { %3989 = sst [smem:[#allocation12_spill]] %s3978_s14 }
   0x4   :  { %3990 = sst [smem:[#allocation13_spill]] %s3979_s15 }
   0x5   :  { %20 = vsyncpa [#allocation3], 0 }
   0x6   :  { %22 = vsyncpa [#allocation3 + $0x1], 0  ;;  %s3448_s18 = smov 0   ;;  %s3450_s19 = smov 0  }
   0x7   :  { %s3452_s20 = smov 0   ;;  %s3454_s21 = smov 0  }
   0x8   :  { %s3456_s22 = smov 0   ;;  %s3458_s23 = smov 0  }
   0x9   :  { %s3460_s24 = smov 0   ;;  %s3462_s25 = smov 0  }
   0xa LB: > { %3991 = sst [smem:[#allocation5_spill]] %s3327_s18  ;;  %s2833_s26 = sadd.s32 4294967295, %s3355_s25   ;;  %s3355_s25 = sphi %s3462_s25, %s28_s25   ;;  %s3351_s24 = sphi %s3460_s24, %s4012_s24   ;;  %s3347_s23 = sphi %s3458_s23, %s4006_s23   ;;  %s3343_s22 = sphi %s3456_s22, %s4011_s22   ;;  %s3339_s21 = sphi %s3454_s21, %s4005_s21   ;;  %s3335_s20 = sphi %s3452_s20, %s4010_s20   ;;  %s3331_s19 = sphi %s3450_s19, %s4009_s19   ;;  %s3327_s18 = sphi %s3448_s18, %s4008_s18  }
   0xb   : > { %3992 = sst [smem:[#allocation6_spill]] %s3347_s23  ;;  %s2834_s27 = sadd.s32 4294967294, %s3355_s25  }
   0xc   : > { %s37_s28 = sadd.s32 1, %s3347_s23  ;;  %s40_s29 = sadd.s32 1, %s3351_s24 }
   0xd   : > { %p38_p0 = scmp.ge.s32.totalorder %s37_s28, 2  ;;  %p413_p1 = scmp.ne.s32.totalorder %s3335_s20, %s3331_s19 }
   0xe   : > { %p414_p2 = scmp.eq.s32.totalorder %s2833_s26, 3  ;;  %p419_p5 = scmp.ne.s32.totalorder %s3331_s19, %s3327_s18 }
   0xf   : > { %s4014_s28 = smov (%p38_p0, %s37_s28), 0  ;;  %s4016_s29 = smov (!%p38_p0, %s40_s29), %s3351_s24 }
  0x10   : > { %3993 = sst [smem:[#allocation7_spill]] %s4014_s28  ;;  %s399_s30 = ssub.s32 %s3347_s23, %s4014_s28 }
  0x11   : > { %p3499_p3 = por %p414_p2, %p413_p1  ;;  %p42_p4 = scmp.ge.s32.totalorder %s4016_s29, 2 }
  0x12   : > { %p420_p6 = scmp.eq.s32.totalorder %s2834_s27, 3  ;;  %p2837_p7 = scmp.ge.s32.totalorder %s3355_s25, 1 }
  0x13   : > { %s4018_s29 = smov (%p42_p4, %s4016_s29), 0  ;;  %p522_p9 = scmp.lt.s32.totalorder %s3355_s25, 5 }
  0x14   : > { %3995 = sst [smem:[#allocation8_spill]] %s4018_s29  ;;  %p3508_p8 = por %p420_p6, %p419_p5 }
  0x15   : > { %s398_s26 = ssub.s32 %s3351_s24, %s4018_s29  ;;  %s403_s15 = sadd.s32 1, %s3335_s20 }
  0x16   : > { %s3996_s17 = scalar_select %p3508_p8, 1, 0 }
  0x17   : > { %s400_s14 = sor.u32 %s399_s30, %s398_s26  ;;  %p523_p10 = pnand %p2837_p7, %p522_p9 }
  0x18   : > { %3997 = sst [smem:[#allocation9_spill]] %s3996_s17  ;;  %p401_p11 = scmp.eq.s32.totalorder %s400_s14, 0  ;;  %vm651_vm0 = vcmask (!%p523_p10), 261120   ;;  %v3357_v5 = vmov (!%p523_p10), 0.0   ;;  %vm3358_vm1 = vmmov (!%p523_p10), 0   ;;  %v674_v16 = vlaneseq (!%p523_p10)  ;;  %v3559_v24 = vld [vmem:[%s3977_s13] sm:$0xff] (!%p523_p10) }
  0x19   : > { %526 = sbr.rel (%p523_p10) target bundleno = 3980 (0xf8c), region = 80  ;;  %p604_p12 = scmp.lt.s32.totalorder (!%p523_p10), %s3343_s22, 1  ;;  %2965 = vmatprep.subr.bf16.mxu0 (!%p523_p10), %v3357_v5  ;;  %2969 = vmatprep.mubr.msk.bf16.mxu0 (!%p523_p10), %vm3358_vm1, %v3357_v5  ;;  %vm923_vm4 = vcmask (!%p523_p10), 64512   ;;  %v3362_v46 = vmov (!%p523_p10), 1983009808   ;;  %vm1123_vm5 = vcmask (!%p523_p10), 130048  }
  0x1a   : > { %s3517_s28 = scalar_select %p401_p11, %s3335_s20, %s403_s15  }
  0x1b   : > { %p606_p13 = scmp.lt.s32.totalorder (!%p523_p10), %s3339_s21, 1  ;;  %s3998_s0 = sld [smem:[#allocation10_spill]] (!%p523_p10)  ;;  %2973 = vmatprep.subr.bf16.mxu1 (!%p523_p10), %v3357_v5  ;;  %2975 = vmatprep.mubr.msk.bf16.mxu1 (!%p523_p10), %vm3358_vm1, %v3357_v5  ;;  %v3553_v20 = vshrl.u32 (!%p523_p10), %v674_v16, 7  ;;  %v781_v47 = vunpack.c.l.s4 (!%p523_p10), %v3362_v46  ;;  %v3363_v48 = vmov (!%p523_p10), 1934713408   ;;  %vm1518_vm6 = vcmask (!%p523_p10), 195584  }
  0x1c   : > { %s3999_s7 = sld [smem:[#allocation11_spill]] (!%p523_p10)  ;;  %v813_v49 = vunpack.c.l.s4 (!%p523_p10), %v3363_v48  ;;  %vm2081_vm9 = vcmask (!%p523_p10), 1043456   ;;  %vm2618_vm12 = vcmask (!%p523_p10), 523264   ;;  %s4002_s15 = sld [smem:[#allocation13_spill]] (!%p523_p10) }
  0x1d   : > { %v676_v23 = vsub.s32 (!%p523_p10), 5, %v3553_v20  ;;  %v684_v27 = vsub.s32 (!%p523_p10), 6, %v3553_v20  ;;  %v3569_v34 = vsub.s32 (!%p523_p10), 0, %v3553_v20  ;;  %v782_v50 = vunpack.c.0.s8 (!%p523_p10), %v781_v47 }
  0x1e   : > { %v814_v53 = vunpack.c.0.s8 (!%p523_p10), %v813_v49 }
  0x1f   : > { %v677_v25 = vrot.slane (!%p523_p10), %v3559_v24, %v676_v23  ;;  %v685_v29 = vrot.slane (!%p523_p10), %v3559_v24, %v684_v27  ;;  %v711_v35 = vrot.slane (!%p523_p10), %v3559_v24, %v3569_v34  ;;  %v3594_v54 = vsub.s32 (!%p523_p10), %v782_v50, %v3553_v20 }
  0x20   : > { %s3522_s27 = scalar_select %p604_p12, %s3343_s22, 1  ;;  %v3597_v60 = vsub.s32 %v814_v53, %v3553_v20 }
  0x21   : > { %s607_s23 = scalar_select %p606_p13, %s3339_s21, 1 }
  0x22   : > { %s2839_s17 = sshll.u32 %s3522_s27, 1  ;;  %v3194_v4 = vld [vmem:[%s3999_s7] sm:$0xff]   ;;  %v3195_v6 = vld [vmem:[%s3999_s7 + $0x8] sm:$0xff]  }
  0x23   : > { %s3526_s18 = sadd.s32 %s2839_s17, %s607_s23  ;;  %2966 = vmatpush3.bf16.msra.mxu0 %v3194_v4  ;;  %s2909_s23 = sshll.u32 %s3522_s27, 5 }
  0x24   : > { %s2840_s30 = sshll.u32 %s3526_s18, 3  ;;  %2967 = vmatprep.subr.bf16.mxu0 %v3357_v5  ;;  %s3985_s17 = smov 104  }
  0x25   : > { %s611_s26 = scalar_lea.vmem %s3998_s0, %s2840_s30  ;;  %s3360_s30 = smov 120  }
  0x26   : > { %v3532_v0 = vld [vmem:[%s611_s26] sm:$0xff]  ;;  %s3579_s26 = scalar_lea.vmem %s3967_s3, %s2909_s23  ;;  %s3361_s0 = smov 112  }
  0x27   : > { %v652_v1 = vsel %vm651_vm0, %v3532_v0, 0.0  ;;  %v657_v2 = vmul.f32 %v3532_v0, %v3532_v0  ;;  %2968 = vmatpush3.bf16.msra.mxu0 %v3195_v6  ;;  %v3196_v42 = vld [vmem:[%s3579_s26] sm:$0xff]   ;;  %v3197_v43 = vld [vmem:[%s3579_s26 + $0x8] sm:$0xff]   ;;  %s3588_s29 = scalar_lea.vmem %s3968_s4, %s2909_s23  ;;  %v3199_v23 = vld [vmem:[%s3579_s26 + $0x18] sm:$0xff]   ;;  %s2842_s7 = sshll.u32 %s3526_s18, 2 }
  0x28   : > { %653 = vadd.xlane.f32.xlu0 %v652_v1  ;;  %2979 = vmatprep.subr.bf16.mxu0 %v3357_v5  ;;  %v928_v44 = vsel %vm923_vm4, %v3196_v42, 0  ;;  %v979_v45 = vsel %vm923_vm4, %v3197_v43, 0  ;;  %s619_s14 = scalar_lea.vmem %s3965_s1, %s2842_s7  ;;  %s3364_s7 = smov 16  }
  0x29   : > { %v658_v3 = vsel %vm651_vm0, %v657_v2, 0.0  ;;  %2974 = vmatpush3.bf16.xpose.msra.mxu1 %v928_v44  ;;  %v647_v42 = vld [vmem:[%s619_s14] sm:$0xf]  ;;  %s3365_s23 = smov 8   ;;  %s2911_s18 = sshll.u32 %s3522_s27, 4 }
  0x2a   : > { %2985 = vmatprep.subr.bf16.mxu1 %v3357_v5  ;;  %v648_v43 = vunpack.c.l.bf16 %v647_v42  ;;  %s4000_s14 = smov 104  }
  0x2c   : > { %659 = vadd.xlane.f32.xlu0 %v658_v3 }
  0xb5   : > { %v654_v7 = vpop.xlane.xlu0 %653 }
  0xb6   : > { %v656_v8 = vmul.f32 0.03125, %v654_v7 }
  0xb8   : > { %v662_v10 = vmul.f32 %v656_v8, %v656_v8  ;;  %v673_v26 = vsub.f32 %v3532_v0, %v656_v8 }
  0xb9   : > { %v660_v9 = vpop.xlane.xlu0 %659 }
  0xba   : > { %v661_v11 = vmul.f32 0.03125, %v660_v9  ;;  %v678_v28 = vmul.f32 %v677_v25, %v673_v26 }
  0xbc   : > { %v663_v12 = vsub.f32 %v661_v11, %v662_v10 }
  0xbe   : > { %v664_v13 = vmul.f32 1.032258, %v663_v12 }
  0xc0   : > { %v665_v14 = vmax.f32 %v664_v13, 0.0 }
  0xc2   : > { %3216 = vrsqrt.f32 %v665_v14  ;;  %vm668_vm2 = vcmp.eq.f32.partialorder %v665_v14, inf  ;;  %v671_v18 = vand.u32 2147483648, %v665_v14  ;;  %vm670_vm3 = vcmp.eq.f32.partialorder %v665_v14, 0.0 }
  0xcc   : > { %v3217_v15 = vpop.eup %3216 }
  0xcd   : > { %v667_v17 = vmul.f32 %v3217_v15, %v665_v14 }
  0xcf   : > { %v669_v19 = vsel %vm668_vm2, %v665_v14, %v667_v17 }
  0xd0   : > { %v672_v21 = vsel %vm670_vm3, %v671_v18, %v669_v19 }
  0xd1   : > { %v679_v22 = vadd.f32 1e-06, %v672_v21 }
  0xd3   : > { %3218 = vrcp.f32 %v679_v22  ;;  %v3198_v22 = vld [vmem:[%s3579_s26 + $0x10] sm:$0xff]   ;;  %s3743_s26 = scalar_lea.vmem %s3969_s5, %s2911_s18 }
  0xdd   : > { %v3219_v30 = vpop.eup %3218 }
  0xde   : > { %v681_v31 = vmul.f32 %v3219_v30, %v678_v28 }
  0xe0   : > { %v686_v32 = vadd.f32 %v685_v29, %v681_v31  ;;  %v1030_v31 = vsel %vm923_vm4, %v3198_v22, 0 }
  0xe2   : > { %v703_v33 = vpack.c.bf16 %v686_v32, %v686_v32  ;;  %v1081_v32 = vsel %vm923_vm4, %v3199_v23, 0 }
  0xe4   : > { %2970 = vmatmul.mubr.msk.bf16.vlgmr.msra.gmra.mrb[0].mxu0 %vm651_vm0, %v703_v33 }
  0xe5   : > { %2981 = vmatprep.mubr.msk.bf16.mxu0 %vm3358_vm1, %v3357_v5  ;;  %2980 = vmatpush3.bf16.xpose.msra.mxu0 %v979_v45 }
  0xe6   : > { %2991 = vmatprep.subr.bf16.mxu0 %v3357_v5 }
 0x1b7   : > { %v761_v36 = vpop.f32.mrb[0].mxu0 }
 0x1b8   : > { %v762_v37 = vadd.f32 %v761_v36, %v711_v35  ;;  %v2971_v38 = vpop.f32.mrb[1].mxu0 }
 0x1b9   : > { %v764_v39 = vpop.f32.mrb[2].mxu0 }
 0x1ba   : > { %v767_v40 = vmul.f32 0.35355338, %v762_v37  ;;  %v2972_v41 = vpop.f32.mrb[3].mxu0 }
 0x1bc   : > { %775 = vrot.lane.b32.xlu0 %v767_v40, %s3985_s17  ;;  %769 = vrot.lane.b32.xlu1 %v767_v40, %s3360_s30  ;;  %s3366_s17 = smov 24  }
 0x1c0   : > { %772 = vrot.lane.b32.xlu1 %v767_v40, %s3361_s0 }
 0x22e   : > { %v776_v51 = vpop.permute.xlu0 %775  ;;  %v770_v52 = vpop.permute.xlu1 %769 }
 0x22f   : > { %v794_v55 = vcombine.low %v770_v52, %v776_v51  ;;  %v795_v56 = vcombine.high %v770_v52, %v776_v51 }
 0x231   : > { %v802_v61 = vrot.slane %v794_v55, %v3594_v54  ;;  %v809_v62 = vrot.slane %v795_v56, %v3594_v54 }
 0x232   : > { %v773_v57 = vpop.permute.xlu1 %772 }
 0x233   : > { %v778_v58 = vcombine.low %v767_v40, %v773_v57  ;;  %v779_v59 = vcombine.high %v767_v40, %v773_v57 }
 0x235   : > { %v786_v63 = vrot.slane %v778_v58, %v3594_v54  ;;  %v793_v1 = vrot.slane %v779_v59, %v3594_v54 }
 0x237   : > { %v810_v2 = vcombine.low %v786_v63, %v802_v61  ;;  %v811_v3 = vcombine.high %v786_v63, %v802_v61  ;;  %v826_v4 = vcombine.low %v793_v1, %v809_v62  ;;  %v827_v6 = vcombine.high %v793_v1, %v809_v62 }
 0x239   : > { %v818_v7 = vrot.slane %v810_v2, %v3597_v60  ;;  %v825_v8 = vrot.slane %v811_v3, %v3597_v60  ;;  %v834_v9 = vrot.slane %v826_v4, %v3597_v60  ;;  %v841_v10 = vrot.slane %v827_v6, %v3597_v60 }
 0x23b   : > { %v846_v11 = vcombine.low %v818_v7, %v825_v8  ;;  %v2854_v12 = vcombine.high %v818_v7, %v825_v8  ;;  %v862_v13 = vcombine.low %v834_v9, %v841_v10  ;;  %v2855_v14 = vcombine.high %v834_v9, %v841_v10 }
 0x23d   : > { %v853_v15 = vrot.slane %v846_v11, %v3594_v54  ;;  %v861_v16 = vrot.slane %v2854_v12, %v3594_v54  ;;  %v869_v17 = vrot.slane %v862_v13, %v3594_v54  ;;  %v877_v18 = vrot.slane %v2855_v14, %v3594_v54 }
 0x23f   : > { %v878_v19 = vcombine.low %v853_v15, %v861_v16  ;;  %v894_v21 = vcombine.low %v869_v17, %v877_v18  ;;  %v879_v25 = vcombine.high %v853_v15, %v861_v16  ;;  %v895_v26 = vcombine.high %v869_v17, %v877_v18 }
 0x241   : > { %v886_v27 = vrot.slane %v878_v19, %v3597_v60  ;;  %v902_v28 = vrot.slane %v894_v21, %v3597_v60  ;;  %v893_v36 = vrot.slane %v879_v25, %v3597_v60  ;;  %v909_v37 = vrot.slane %v895_v26, %v3597_v60 }
 0x243   : > { %v910_v29 = vcombine.low %v886_v27, %v902_v28  ;;  %v911_v30 = vcombine.high %v886_v27, %v902_v28  ;;  %v912_v38 = vcombine.low %v893_v36, %v909_v37  ;;  %v913_v39 = vcombine.high %v893_v36, %v909_v37 }
 0x245   : > { %v914_v33 = vpack.c.bf16 %v910_v29, %v910_v29  ;;  %v915_v35 = vpack.c.bf16 %v911_v30, %v911_v30  ;;  %v916_v40 = vpack.c.bf16 %v912_v38, %v912_v38  ;;  %v917_v41 = vpack.c.bf16 %v913_v39, %v913_v39  ;;  %v3200_v30 = vld [vmem:[%s3588_s29] sm:$0xff]   ;;  %v3202_v39 = vld [vmem:[%s3588_s29 + $0x10] sm:$0xff]  }
 0x247   : > { %2976 = vmatmul.mubr.msk.bf16.vlgmr.msra.gmra.mrb[0].mxu1 %vm923_vm4, %v914_v33  ;;  %2982 = vmatmul.mubr.msk.bf16.vlgmr.msra.gmra.mrb[4].mxu0 %vm923_vm4, %v915_v35 }
 0x248   : > { %2986 = vmatpush3.bf16.xpose.msra.mxu1 %v1030_v31  ;;  %2992 = vmatpush3.bf16.xpose.msra.mxu0 %v1081_v32  ;;  %v3201_v31 = vld [vmem:[%s3588_s29 + $0x8] sm:$0xff]  }
 0x249   : > { %2987 = vmatprep.mubr.msk.bf16.mxu1 %vm3358_vm1, %v3357_v5  ;;  %2993 = vmatprep.mubr.msk.bf16.mxu0 %vm3358_vm1, %v3357_v5 }
 0x24a   : > { %2997 = vmatprep.subr.bf16.mxu1 %v3357_v5  ;;  %3003 = vmatprep.subr.bf16.mxu0 %v3357_v5 }
 0x24f   : > { %2988 = vmatmul.mubr.msk.bf16.vlgmr.msra.gmra.mrb[4].mxu1 %vm923_vm4, %v916_v40  ;;  %2994 = vmatmul.mubr.msk.bf16.vlgmr.msra.gmra.mrb[8].mxu0 %vm923_vm4, %v917_v41 }
 0x250   : > { %2999 = vmatprep.mubr.msk.bf16.mxu1 %vm3358_vm1, %v3357_v5  ;;  %3005 = vmatprep.mubr.msk.bf16.mxu0 %vm3358_vm1, %v3357_v5 }
 0x251   : > { %2998 = vmatpush3.bf16.msra.mxu1 %v3200_v30  ;;  %3004 = vmatpush3.bf16.msra.mxu0 %v3201_v31 }
 0x252   : > { %3009 = vmatprep.subr.bf16.mxu1 %v3357_v5  ;;  %3015 = vmatprep.subr.bf16.mxu0 %v3357_v5 }
 0x31a   : > { %v964_v44 = vpop.f32.mrb[0].mxu1  ;;  %v1015_v45 = vpop.f32.mrb[4].mxu0 }
 0x31b   : > { %v965_v46 = vadd.f32 %v964_v44, %v648_v43  ;;  %v1016_v47 = vadd.f32 %v1015_v45, %v648_v43  ;;  %v2977_v48 = vpop.f32.mrb[1].mxu1  ;;  %v2983_v49 = vpop.f32.mrb[5].mxu0 }
 0x31c   : > { %v967_v50 = vpop.f32.mrb[2].mxu1  ;;  %v1018_v51 = vpop.f32.mrb[6].mxu0 }
 0x31d   : > { %v2978_v52 = vpop.f32.mrb[3].mxu1  ;;  %v2984_v53 = vpop.f32.mrb[7].mxu0  ;;  %v1124_v55 = vsel %vm1123_vm5, %v965_v46, -inf  ;;  %v1127_v56 = vsel %vm1123_vm5, %v1016_v47, -inf  ;;  %v3204_v51 = vld [vmem:[%s3972_s8] sm:$0xff]  }
 0x31e   : > { %1125 = vmax.xlane.f32.xlu1 %v1124_v55  ;;  %1128 = vmax.xlane.f32.xlu0 %v1127_v56 }
 0x322   : > { %v1066_v57 = vpop.f32.mrb[4].mxu1  ;;  %v1117_v58 = vpop.f32.mrb[8].mxu0 }
 0x323   : > { %v1067_v59 = vadd.f32 %v1066_v57, %v648_v43  ;;  %v1118_v61 = vadd.f32 %v1117_v58, %v648_v43  ;;  %v2989_v62 = vpop.f32.mrb[5].mxu1  ;;  %v2995_v63 = vpop.f32.mrb[9].mxu0  ;;  %v3203_v43 = vld [vmem:[%s3588_s29 + $0x18] sm:$0xff]   ;;  %s622_s29 = scalar_lea.vmem %s3966_s2, %s3522_s27 }
 0x324   : > { %v1069_v1 = vpop.f32.mrb[6].mxu1  ;;  %v1120_v2 = vpop.f32.mrb[10].mxu0 }
 0x325   : > { %v2990_v3 = vpop.f32.mrb[7].mxu1  ;;  %v2996_v4 = vpop.f32.mrb[11].mxu0  ;;  %v1130_v6 = vsel %vm1123_vm5, %v1067_v59, -inf  ;;  %v1133_v7 = vsel %vm1123_vm5, %v1118_v61, -inf }
 0x326   : > { %1131 = vmax.xlane.f32.xlu1 %v1130_v6 }
 0x32a   : > { %1134 = vmax.xlane.f32.xlu1 %v1133_v7 }
 0x3ab   : > { %v1126_v8 = vpop.xlane.xlu1 %1125  ;;  %v1129_v9 = vpop.xlane.xlu0 %1128 }
 0x3ac   : > { %v1136_v10 = vsub.f32 %v965_v46, %v1126_v8  ;;  %v1137_v11 = vsub.f32 %v1016_v47, %v1129_v9 }
 0x3ae   : > { %v1140_v12 = vmul.f32 1.442695, %v1136_v10  ;;  %v1142_v13 = vmul.f32 1.442695, %v1137_v11 }
 0x3b0   : > { %3220 = vpow2.f32 %v1140_v12 }
 0x3b1   : > { %3222 = vpow2.f32 %v1142_v13 }
 0x3b3   : > { %v1132_v14 = vpop.xlane.xlu1 %1131 }
 0x3b4   : > { %v1138_v15 = vsub.f32 %v1067_v59, %v1132_v14 }
 0x3b6   : > { %v1144_v16 = vmul.f32 1.442695, %v1138_v15 }
 0x3b7   : > { %v1135_v17 = vpop.xlane.xlu1 %1134 }
 0x3b8   : > { %3224 = vpow2.f32 %v1144_v16  ;;  %v1139_v18 = vsub.f32 %v1118_v61, %v1135_v17 }
 0x3ba   : > { %v3221_v19 = vpop.eup %3220  ;;  %v1146_v21 = vmul.f32 1.442695, %v1139_v18 }
 0x3bb   : > { %v1148_v22 = vsel %vm1123_vm5, %v3221_v19, 0.0  ;;  %v3223_v23 = vpop.eup %3222 }
 0x3bc   : > { %3226 = vpow2.f32 %v1146_v21  ;;  %1149 = vadd.xlane.f32.xlu1 %v1148_v22  ;;  %v1151_v25 = vsel %vm1123_vm5, %v3223_v23, 0.0  ;;  %v3205_v21 = vld [vmem:[%s3972_s8 + $0x8] sm:$0xff]  }
 0x3c0   : > { %1152 = vadd.xlane.f32.xlu1 %v1151_v25 }
 0x3c2   : > { %v3225_v26 = vpop.eup %3224 }
 0x3c3   : > { %v1154_v27 = vsel %vm1123_vm5, %v3225_v26, 0.0 }
 0x3c4   : > { %1155 = vadd.xlane.f32.xlu1 %v1154_v27 }
 0x3c6   : > { %v3227_v28 = vpop.eup %3226 }
 0x3c7   : > { %v1157_v29 = vsel %vm1123_vm5, %v3227_v28, 0.0 }
 0x3c8   : > { %1158 = vadd.xlane.f32.xlu0 %v1157_v29 }
 0x449   : > { %v1150_v32 = vpop.xlane.xlu1 %1149 }
 0x44a   : > { %3228 = vrcp.f32 %v1150_v32 }
 0x44d   : > { %v1153_v33 = vpop.xlane.xlu1 %1152 }
 0x44e   : > { %3230 = vrcp.f32 %v1153_v33 }
 0x451   : > { %v1156_v35 = vpop.xlane.xlu1 %1155 }
 0x452   : > { %3232 = vrcp.f32 %v1156_v35 }
 0x454   : > { %v3229_v36 = vpop.eup %3228 }
 0x455   : > { %v1164_v37 = vmul.f32 %v3229_v36, %v3221_v19  ;;  %v1159_v38 = vpop.xlane.xlu0 %1158 }
 0x456   : > { %3234 = vrcp.f32 %v1159_v38 }
 0x457   : > { %v1168_v40 = vpack.c.bf16 %v1164_v37, %v1164_v37 }
 0x458   : > { %v3231_v41 = vpop.eup %3230 }
 0x459   : > { %v1165_v42 = vmul.f32 %v3231_v41, %v3223_v23  ;;  %3000 = vmatmul.mubr.msk.bf16.vlgmr.msra.gmra.mrb[8].mxu1 %vm1123_vm5, %v1168_v40 }
 0x45a   : > { %3010 = vmatpush3.bf16.msra.mxu1 %v3202_v39  ;;  %3011 = vmatprep.mubr.msk.bf16.mxu1 %vm3358_vm1, %v3357_v5 }
 0x45b   : > { %v1169_v44 = vpack.c.bf16 %v1165_v42, %v1165_v42  ;;  %3021 = vmatprep.subr.bf16.mxu1 %v3357_v5 }
 0x45c   : > { %v3233_v45 = vpop.eup %3232 }
 0x45d   : > { %v1166_v46 = vmul.f32 %v3233_v45, %v3225_v26  ;;  %3006 = vmatmul.mubr.msk.bf16.vlgmr.msra.gmra.mrb[12].mxu0 %vm1123_vm5, %v1169_v44 }
 0x45e   : > { %3016 = vmatpush3.bf16.msra.mxu0 %v3203_v43  ;;  %3017 = vmatprep.mubr.msk.bf16.mxu0 %vm3358_vm1, %v3357_v5 }
 0x45f   : > { %v1170_v47 = vpack.c.bf16 %v1166_v46, %v1166_v46  ;;  %3029 = vmatprep.subr.bf16.mxu0 %v3357_v5 }
 0x460   : > { %v3235_v48 = vpop.eup %3234 }
 0x461   : > { %v1167_v49 = vmul.f32 %v3235_v48, %v3227_v28  ;;  %3012 = vmatmul.mubr.msk.bf16.vlgmr.msra.gmra.mrb[12].mxu1 %vm1123_vm5, %v1170_v47 }
 0x462   : > { %3025 = vmatprep.mubr.msk.bf16.mxu1 %vm3358_vm1, %v3357_v5  ;;  %3022 = vmatpush3.bf16.msra.mxu1 %v3204_v51 }
 0x463   : > { %v1171_v50 = vpack.c.bf16 %v1167_v49, %v1167_v49  ;;  %3023 = vmatprep.subr.bf16.mxu1 %v3357_v5 }
 0x465   : > { %3018 = vmatmul.mubr.msk.bf16.vlgmr.msra.gmra.mrb[16].mxu0 %vm1123_vm5, %v1171_v50 }
 0x466   : > { %3033 = vmatprep.mubr.msk.bf16.mxu0 %vm3358_vm1, %v3357_v5  ;;  %3024 = vmatpush3.bf16.msra.mxu1 %v3205_v21 }
 0x467   : > { %3037 = vmatprep.subr.bf16.mxu1 %v3357_v5 }
 0x52c   : > { %v1215_v52 = vpop.f32.mrb[8].mxu1 }
 0x52d   : > { %v3001_v53 = vpop.f32.mrb[9].mxu1 }
 0x52e   : > { %v1218_v55 = vpop.f32.mrb[10].mxu1 }
 0x52f   : > { %v3002_v56 = vpop.f32.mrb[11].mxu1 }
 0x530   : > { %v1264_v57 = vpop.f32.mrb[12].mxu0  ;;  %v1527_v56 = vsub.s32 1, %v3553_v20 }
 0x531   : > { %v3007_v58 = vpop.f32.mrb[13].mxu0 }
 0x532   : > { %v1267_v59 = vpop.f32.mrb[14].mxu0 }
 0x533   : > { %v3008_v61 = vpop.f32.mrb[15].mxu0 }
 0x534   : > { %v1313_v62 = vpop.f32.mrb[12].mxu1 }
 0x535   : > { %v1368_v63 = vcombine.low %v1215_v52, %v1313_v62  ;;  %v1369_v1 = vcombine.high %v1215_v52, %v1313_v62  ;;  %v3013_v2 = vpop.f32.mrb[13].mxu1 }
 0x536   : > { %v1316_v3 = vpop.f32.mrb[14].mxu1 }
 0x537   : > { %v3014_v4 = vpop.f32.mrb[15].mxu1  ;;  %v1376_v11 = vrot.slane %v1368_v63, %v3594_v54  ;;  %v1383_v12 = vrot.slane %v1369_v1, %v3594_v54 }
 0x538   : > { %v1362_v6 = vpop.f32.mrb[16].mxu0 }
 0x539   : > { %v1384_v7 = vcombine.low %v1264_v57, %v1362_v6  ;;  %v1385_v8 = vcombine.high %v1264_v57, %v1362_v6  ;;  %v3019_v9 = vpop.f32.mrb[17].mxu0  ;;  %v1528_v57 = vrot.slane %v3559_v24, %v1527_v56  ;;  %v3206_v6 = vld [vmem:[%s3973_s9] sm:$0xff]  }
 0x53a   : > { %v1365_v10 = vpop.f32.mrb[18].mxu0  ;;  %3030 = vmatpush3.bf16.msra.mxu0 %v3206_v6 }
 0x53b   : > { %v1392_v13 = vrot.slane %v1384_v7, %v3594_v54  ;;  %v1399_v14 = vrot.slane %v1385_v8, %v3594_v54  ;;  %v3020_v15 = vpop.f32.mrb[19].mxu0  ;;  %3031 = vmatprep.subr.bf16.mxu0 %v3357_v5 }
 0x53d   : > { %v1400_v16 = vcombine.low %v1376_v11, %v1392_v13  ;;  %v1401_v17 = vcombine.high %v1376_v11, %v1392_v13  ;;  %v1416_v18 = vcombine.low %v1383_v12, %v1399_v14  ;;  %v1417_v19 = vcombine.high %v1383_v12, %v1399_v14 }
 0x53f   : > { %v1408_v22 = vrot.slane %v1400_v16, %v3597_v60  ;;  %v1415_v23 = vrot.slane %v1401_v17, %v3597_v60  ;;  %v1424_v25 = vrot.slane %v1416_v18, %v3597_v60  ;;  %v1431_v26 = vrot.slane %v1417_v19, %v3597_v60 }
 0x541   : > { %v1436_v27 = vcombine.low %v1408_v22, %v1415_v23  ;;  %v2872_v28 = vcombine.high %v1408_v22, %v1415_v23  ;;  %v1452_v29 = vcombine.low %v1424_v25, %v1431_v26  ;;  %v2873_v30 = vcombine.high %v1424_v25, %v1431_v26  ;;  %v3724_v26 = vld [vmem:[%s3977_s13 + $0x8] sm:$0xff] }
 0x542   : > { %v1608_v22 = vsub.s32 7, %v3553_v20 }
 0x543   : > { %v1443_v31 = vrot.slane %v1436_v27, %v3594_v54  ;;  %v1451_v32 = vrot.slane %v2872_v28, %v3594_v54  ;;  %v1459_v33 = vrot.slane %v1452_v29, %v3594_v54  ;;  %v1467_v35 = vrot.slane %v2873_v30, %v3594_v54 }
 0x544   : > { %v1609_v23 = vrot.slane %v3559_v24, %v1608_v22  ;;  %v1617_v27 = vrot.slane %v3724_v26, %v3569_v34 }
 0x545   : > { %v1469_v36 = vcombine.high %v1443_v31, %v1451_v32  ;;  %v1485_v37 = vcombine.high %v1459_v33, %v1467_v35  ;;  %v1468_v38 = vcombine.low %v1443_v31, %v1451_v32  ;;  %v1484_v39 = vcombine.low %v1459_v33, %v1467_v35 }
 0x546   : > { %v1634_v33 = vsub.s32 2, %v3553_v20 }
 0x547   : > { %v1483_v40 = vrot.slane %v1469_v36, %v3597_v60  ;;  %v1499_v41 = vrot.slane %v1485_v37, %v3597_v60  ;;  %v1476_v42 = vrot.slane %v1468_v38, %v3597_v60  ;;  %v1492_v43 = vrot.slane %v1484_v39, %v3597_v60 }
 0x548   : > { %v1635_v35 = vrot.slane %v3559_v24, %v1634_v33  ;;  %v1619_v24 = vld [vmem:[%s3743_s26] sm:$0xf] }
 0x549   : > { %v1502_v44 = vcombine.low %v1483_v40, %v1499_v41  ;;  %v1501_v45 = vcombine.high %v1476_v42, %v1492_v43  ;;  %v1503_v46 = vcombine.high %v1483_v40, %v1499_v41  ;;  %v1500_v47 = vcombine.low %v1476_v42, %v1492_v43  ;;  %v1620_v42 = vld [vmem:[%s3743_s26 + $0x4] sm:$0xf] }
 0x54a   : > { %v1850_v43 = vsel %vm923_vm4, %v1619_v24, 0 }
 0x54b   : > { %1509 = vrot.lane.b32.xlu0 %v1502_v44, %s3364_s7  ;;  %1505 = vrot.lane.b32.xlu1 %v1501_v45, %s3365_s23  ;;  %v1896_v44 = vsel %vm923_vm4, %v1620_v42, 0 }
 0x54f   : > { %1513 = vrot.lane.b32.xlu1 %v1503_v46, %s3366_s17 }
 0x5bd   : > { %v1506_v48 = vpop.permute.xlu1 %1505  ;;  %v1510_v49 = vpop.permute.xlu0 %1509 }
 0x5be   : > { %v1516_v50 = vsel %vm923_vm4, %v1500_v47, %v1506_v48 }
 0x5bf   : > { %v1517_v52 = vsel %vm1123_vm5, %v1516_v50, %v1510_v49 }
 0x5c1   : > { %v1514_v51 = vpop.permute.xlu1 %1513 }
 0x5c2   : > { %v1519_v53 = vsel %vm1518_vm6, %v1517_v52, %v1514_v51 }
 0x5c3   : > { %v1520_v55 = vpack.c.bf16 %v1519_v53, %v1519_v53 }
 0x5c5   : > { %3026 = vmatmul.mubr.msk.bf16.vlgmr.msra.gmra.mrb[16].mxu1 %vm651_vm0, %v1520_v55 }
 0x5c6   : > { %3039 = vmatprep.mubr.msk.bf16.mxu1 %vm3358_vm1, %v3357_v5  ;;  %3038 = vmatpush3.bf16.xpose.msra.mxu1 %v1850_v43 }
 0x5c7   : > { %3049 = vmatprep.subr.bf16.mxu1 %v3357_v5 }
 0x698   : > { %v1578_v58 = vpop.f32.mrb[16].mxu1 }
 0x699   : > { %v1579_v59 = vadd.f32 %v1578_v58, %v1528_v57  ;;  %v3027_v61 = vpop.f32.mrb[17].mxu1 }
 0x69a   : > { %v1581_v62 = vpop.f32.mrb[18].mxu1 }
 0x69b   : > { %v3703_v63 = vadd.f32 %v1579_v59, %v3532_v0  ;;  %v3028_v1 = vpop.f32.mrb[19].mxu1  ;;  %v3207_v0 = vld [vmem:[%s3973_s9 + $0x8] sm:$0xff]  }
 0x69c   : > { %3032 = vmatpush3.bf16.msra.mxu0 %v3207_v0 }
 0x69d   : > { %v1585_v2 = vsel %vm651_vm0, %v3703_v63, 0.0  ;;  %v1589_v3 = vmul.f32 %v3703_v63, %v3703_v63  ;;  %3043 = vmatprep.subr.bf16.mxu0 %v3357_v5 }
 0x69e   : > { %1586 = vadd.xlane.f32.xlu1 %v1585_v2 }
 0x69f   : > { %v1590_v4 = vsel %vm651_vm0, %v1589_v3, 0.0 }
 0x6a0   : > { %1591 = vadd.xlane.f32.xlu0 %v1590_v4 }
 0x72b   : > { %v1587_v7 = vpop.xlane.xlu1 %1586 }
 0x72c   : > { %v1588_v8 = vmul.f32 0.03125, %v1587_v7 }
 0x72d   : > { %v1592_v9 = vpop.xlane.xlu0 %1591 }
 0x72e   : > { %v1594_v10 = vmul.f32 %v1588_v8, %v1588_v8  ;;  %v1593_v11 = vmul.f32 0.03125, %v1592_v9  ;;  %v1605_v25 = vsub.f32 %v3703_v63, %v1588_v8 }
 0x730   : > { %v1595_v12 = vsub.f32 %v1593_v11, %v1594_v10  ;;  %v1610_v28 = vmul.f32 %v1609_v23, %v1605_v25 }
 0x732   : > { %v1596_v13 = vmul.f32 1.032258, %v1595_v12 }
 0x734   : > { %v1597_v14 = vmax.f32 %v1596_v13, 0.0 }
 0x736   : > { %3236 = vrsqrt.f32 %v1597_v14  ;;  %vm1600_vm7 = vcmp.eq.f32.partialorder %v1597_v14, inf  ;;  %v1603_v17 = vand.u32 2147483648, %v1597_v14  ;;  %vm1602_vm8 = vcmp.eq.f32.partialorder %v1597_v14, 0.0 }
 0x740   : > { %v3237_v15 = vpop.eup %3236 }
 0x741   : > { %v1599_v16 = vmul.f32 %v3237_v15, %v1597_v14 }
 0x743   : > { %v1601_v18 = vsel %vm1600_vm7, %v1597_v14, %v1599_v16 }
 0x744   : > { %v1604_v19 = vsel %vm1602_vm8, %v1603_v17, %v1601_v18 }
 0x745   : > { %v1611_v21 = vadd.f32 1e-06, %v1604_v19  ;;  %v1621_v19 = vld [vmem:[%s3743_s26 + $0x8] sm:$0xf] }
 0x746   : > { %v1942_v25 = vsel %vm923_vm4, %v1621_v19, 0 }
 0x747   : > { %3238 = vrcp.f32 %v1611_v21  ;;  %v1622_v21 = vld [vmem:[%s3743_s26 + $0xc] sm:$0xf]  ;;  %s4001_s26 = sld [smem:[#allocation12_spill]] }
 0x751   : > { %v3239_v29 = vpop.eup %3238 }
 0x752   : > { %v1613_v30 = vmul.f32 %v3239_v29, %v1610_v28 }
 0x754   : > { %v1618_v31 = vadd.f32 %v1617_v27, %v1613_v30  ;;  %v1988_v27 = vsel %vm923_vm4, %v1622_v21, 0 }
 0x756   : > { %v1627_v32 = vpack.c.bf16 %v1618_v31, %v1618_v31 }
 0x758   : > { %3034 = vmatmul.mubr.msk.bf16.vlgmr.msra.gmra.mrb[20].mxu0 %vm651_vm0, %v1627_v32 }
 0x759   : > { %3045 = vmatprep.mubr.msk.bf16.mxu0 %vm3358_vm1, %v3357_v5  ;;  %3044 = vmatpush3.bf16.xpose.msra.mxu0 %v1896_v44 }
 0x75a   : > { %3055 = vmatprep.subr.bf16.mxu0 %v3357_v5 }
 0x82b   : > { %v1685_v36 = vpop.f32.mrb[20].mxu0 }
 0x82c   : > { %v1686_v37 = vadd.f32 %v1685_v36, %v1635_v35  ;;  %v3035_v38 = vpop.f32.mrb[21].mxu0 }
 0x82d   : > { %v1688_v39 = vpop.f32.mrb[22].mxu0  ;;  %v649_v38 = vld [vmem:[%s622_s29] sm:$0x1] }
 0x82e   : > { %v1691_v40 = vmul.f32 0.35355338, %v1686_v37  ;;  %v3036_v41 = vpop.f32.mrb[23].mxu0  ;;  %v650_v39 = vunpack.c.l.bf16 %v649_v38 }
 0x830   : > { %1696 = vrot.lane.b32.xlu1 %v1691_v40, %s3361_s0  ;;  %1693 = vrot.lane.b32.xlu0 %v1691_v40, %s3360_s30 }
 0x834   : > { %1699 = vrot.lane.b32.xlu1 %v1691_v40, %s4000_s14  ;;  %s642_s14 = scalar_lea.vmem %s3970_s6, %s2911_s18  ;;  %s2905_s18 = sshll.u32 %s3343_s22, 1 }
 0x835   : > { %s2676_s0 = sadd.s32 %s3339_s21, %s2905_s18 }
 0x836   : > { %s2906_s30 = sshll.u32 %s2676_s0, 7 }
 0x8a2   : > { %v1697_v45 = vpop.permute.xlu1 %1696  ;;  %v1694_v48 = vpop.permute.xlu0 %1693 }
 0x8a3   : > { %v1702_v46 = vcombine.low %v1691_v40, %v1697_v45  ;;  %v1703_v47 = vcombine.high %v1691_v40, %v1697_v45  ;;  %v1845_v40 = vrot.slane %v650_v39, %v3569_v34 }
 0x8a5   : > { %v1710_v52 = vrot.slane %v1702_v46, %v3594_v54  ;;  %v1717_v53 = vrot.slane %v1703_v47, %v3594_v54 }
 0x8a6   : > { %v1700_v49 = vpop.permute.xlu1 %1699 }
 0x8a7   : > { %v1718_v50 = vcombine.low %v1694_v48, %v1700_v49  ;;  %v1719_v51 = vcombine.high %v1694_v48, %v1700_v49 }
 0x8a9   : > { %v1726_v55 = vrot.slane %v1718_v50, %v3594_v54  ;;  %v1733_v57 = vrot.slane %v1719_v51, %v3594_v54 }
 0x8ab   : > { %v1734_v58 = vcombine.low %v1710_v52, %v1726_v55  ;;  %v1735_v59 = vcombine.high %v1710_v52, %v1726_v55  ;;  %v1750_v61 = vcombine.low %v1717_v53, %v1733_v57  ;;  %v1751_v62 = vcombine.high %v1717_v53, %v1733_v57 }
 0x8ad   : > { %v1742_v1 = vrot.slane %v1734_v58, %v3597_v60  ;;  %v1749_v2 = vrot.slane %v1735_v59, %v3597_v60  ;;  %v1758_v3 = vrot.slane %v1750_v61, %v3597_v60  ;;  %v1765_v4 = vrot.slane %v1751_v62, %v3597_v60 }
 0x8af   : > { %v1770_v6 = vcombine.low %v1742_v1, %v1749_v2  ;;  %v2880_v0 = vcombine.high %v1742_v1, %v1749_v2  ;;  %v1786_v7 = vcombine.low %v1758_v3, %v1765_v4  ;;  %v2881_v8 = vcombine.high %v1758_v3, %v1765_v4 }
 0x8b1   : > { %v1777_v9 = vrot.slane %v1770_v6, %v3594_v54  ;;  %v1785_v10 = vrot.slane %v2880_v0, %v3594_v54  ;;  %v1793_v11 = vrot.slane %v1786_v7, %v3594_v54  ;;  %v1801_v12 = vrot.slane %v2881_v8, %v3594_v54 }
 0x8b3   : > { %v1802_v13 = vcombine.low %v1777_v9, %v1785_v10  ;;  %v1818_v14 = vcombine.low %v1793_v11, %v1801_v12  ;;  %v1803_v15 = vcombine.high %v1777_v9, %v1785_v10  ;;  %v1819_v16 = vcombine.high %v1793_v11, %v1801_v12 }
 0x8b5   : > { %v1810_v17 = vrot.slane %v1802_v13, %v3597_v60  ;;  %v1826_v18 = vrot.slane %v1818_v14, %v3597_v60  ;;  %v1817_v30 = vrot.slane %v1803_v15, %v3597_v60  ;;  %v1833_v31 = vrot.slane %v1819_v16, %v3597_v60 }
 0x8b7   : > { %v1834_v22 = vcombine.low %v1810_v17, %v1826_v18  ;;  %v1835_v23 = vcombine.high %v1810_v17, %v1826_v18  ;;  %v1836_v32 = vcombine.low %v1817_v30, %v1833_v31  ;;  %v1837_v35 = vcombine.high %v1817_v30, %v1833_v31  ;;  %v1625_v31 = vld [vmem:[%s642_s14 + $0x8] sm:$0xf] }
 0x8b9   : > { %v1838_v28 = vpack.c.bf16 %v1834_v22, %v1834_v22  ;;  %v1839_v29 = vpack.c.bf16 %v1835_v23, %v1835_v23  ;;  %v1840_v36 = vpack.c.bf16 %v1836_v32, %v1836_v32  ;;  %v1841_v37 = vpack.c.bf16 %v1837_v35, %v1837_v35  ;;  %v1626_v35 = vld [vmem:[%s642_s14 + $0xc] sm:$0xf] }
 0x8ba   : > { %v2175_v32 = vsel %vm2081_vm9, %v1625_v31, 0 }
 0x8bb   : > { %3040 = vmatmul.mubr.msk.bf16.vlgmr.msra.gmra.mrb[20].mxu1 %vm923_vm4, %v1838_v28  ;;  %3046 = vmatmul.mubr.msk.bf16.vlgmr.msra.gmra.mrb[24].mxu0 %vm923_vm4, %v1839_v29  ;;  %v1624_v28 = vld [vmem:[%s642_s14 + $0x4] sm:$0xf] }
 0x8bc   : > { %3050 = vmatpush3.bf16.xpose.msra.mxu1 %v1942_v25  ;;  %3056 = vmatpush3.bf16.xpose.msra.mxu0 %v1988_v27  ;;  %v1623_v27 = vld [vmem:[%s642_s14] sm:$0xf]  ;;  %v2129_v30 = vsel %vm2081_vm9, %v1624_v28, 0  ;;  %s601_s14 = sand.u32 1, %s3331_s19  }
 0x8bd   : > { %3051 = vmatprep.mubr.msk.bf16.mxu1 %vm3358_vm1, %v3357_v5  ;;  %3057 = vmatprep.mubr.msk.bf16.mxu0 %vm3358_vm1, %v3357_v5  ;;  %v2083_v29 = vsel %vm2081_vm9, %v1623_v27, 0  ;;  %s2838_s27 = sshll.u32 %s601_s14, 3  ;;  %s2665_s21 = scalar_lea.sflag [#allocation3], %s601_s14 }
 0x8be   : > { %3061 = vmatprep.subr.bf16.mxu1 %v3357_v5  ;;  %3067 = vmatprep.subr.bf16.mxu0 %v3357_v5 }
 0x8c3   : > { %3052 = vmatmul.mubr.msk.bf16.vlgmr.msra.gmra.mrb[24].mxu1 %vm923_vm4, %v1840_v36  ;;  %3058 = vmatmul.mubr.msk.bf16.vlgmr.msra.gmra.mrb[28].mxu0 %vm923_vm4, %v1841_v37  ;;  %v2221_v36 = vsel %vm2081_vm9, %v1626_v35, 0 }
 0x8c4   : > { %3063 = vmatprep.mubr.msk.bf16.mxu1 %vm3358_vm1, %v3357_v5  ;;  %3069 = vmatprep.mubr.msk.bf16.mxu0 %vm3358_vm1, %v3357_v5 }
 0x8c5   : > { %3062 = vmatpush3.bf16.msra.mxu1 %v2083_v29  ;;  %3068 = vmatpush3.bf16.msra.mxu0 %v2129_v30 }
 0x8c6   : > { %3073 = vmatprep.subr.bf16.mxu1 %v3357_v5  ;;  %3079 = vmatprep.subr.bf16.mxu0 %v3357_v5 }
 0x98e   : > { %v1886_v41 = vpop.f32.mrb[20].mxu1  ;;  %v1932_v24 = vpop.f32.mrb[24].mxu0 }
 0x98f   : > { %v1887_v42 = vadd.f32 %v1886_v41, %v1845_v40  ;;  %v1933_v43 = vadd.f32 %v1932_v24, %v1845_v40  ;;  %v3041_v44 = vpop.f32.mrb[21].mxu1  ;;  %v3047_v45 = vpop.f32.mrb[25].mxu0 }
 0x990   : > { %v1889_v46 = vpop.f32.mrb[22].mxu1  ;;  %v1935_v47 = vpop.f32.mrb[26].mxu0 }
 0x991   : > { %v3042_v48 = vpop.f32.mrb[23].mxu1  ;;  %v3048_v49 = vpop.f32.mrb[27].mxu0  ;;  %v2030_v50 = vsel %vm923_vm4, %v1887_v42, -inf  ;;  %v2033_v51 = vsel %vm923_vm4, %v1933_v43, -inf }
 0x992   : > { %2031 = vmax.xlane.f32.xlu0 %v2030_v50  ;;  %2034 = vmax.xlane.f32.xlu1 %v2033_v51 }
 0x996   : > { %v1978_v52 = vpop.f32.mrb[24].mxu1  ;;  %v2024_v53 = vpop.f32.mrb[28].mxu0 }
 0x997   : > { %v1979_v55 = vadd.f32 %v1978_v52, %v1845_v40  ;;  %v3053_v34 = vpop.f32.mrb[25].mxu1  ;;  %v3059_v57 = vpop.f32.mrb[29].mxu0  ;;  %v2025_v61 = vadd.f32 %v2024_v53, %v1845_v40  ;;  %v3208_v52 = vld [vmem:[%s3974_s10] sm:$0xff]  }
 0x998   : > { %v1981_v58 = vpop.f32.mrb[26].mxu1  ;;  %v2027_v59 = vpop.f32.mrb[30].mxu0 }
 0x999   : > { %v3054_v62 = vpop.f32.mrb[27].mxu1  ;;  %v3060_v1 = vpop.f32.mrb[31].mxu0  ;;  %v2036_v2 = vsel %vm923_vm4, %v1979_v55, -inf  ;;  %v2039_v3 = vsel %vm923_vm4, %v2025_v61, -inf }
 0x99a   : > { %2037 = vmax.xlane.f32.xlu0 %v2036_v2 }
 0x99e   : > { %2040 = vmax.xlane.f32.xlu0 %v2039_v3 }
 0xa1f   : > { %v2032_v4 = vpop.xlane.xlu0 %2031  ;;  %v2035_v6 = vpop.xlane.xlu1 %2034 }
 0xa20   : > { %v2042_v0 = vsub.f32 %v1887_v42, %v2032_v4  ;;  %v2043_v7 = vsub.f32 %v1933_v43, %v2035_v6 }
 0xa22   : > { %v2046_v8 = vmul.f32 1.442695, %v2042_v0  ;;  %v2048_v9 = vmul.f32 1.442695, %v2043_v7 }
 0xa24   : > { %3240 = vpow2.f32 %v2046_v8 }
 0xa25   : > { %3242 = vpow2.f32 %v2048_v9 }
 0xa27   : > { %v2038_v10 = vpop.xlane.xlu0 %2037 }
 0xa28   : > { %v2044_v11 = vsub.f32 %v1979_v55, %v2038_v10 }
 0xa2a   : > { %v2050_v12 = vmul.f32 1.442695, %v2044_v11 }
 0xa2b   : > { %v2041_v13 = vpop.xlane.xlu0 %2040 }
 0xa2c   : > { %3244 = vpow2.f32 %v2050_v12  ;;  %v2045_v14 = vsub.f32 %v2025_v61, %v2041_v13 }
 0xa2e   : > { %v3241_v15 = vpop.eup %3240  ;;  %v2052_v16 = vmul.f32 1.442695, %v2045_v14 }
 0xa2f   : > { %v3243_v17 = vpop.eup %3242  ;;  %v2054_v18 = vsel %vm923_vm4, %v3241_v15, 0.0 }
 0xa30   : > { %3246 = vpow2.f32 %v2052_v16  ;;  %2055 = vadd.xlane.f32.xlu1 %v2054_v18  ;;  %v2057_v19 = vsel %vm923_vm4, %v3243_v17, 0.0 }
 0xa31   : > { %2058 = vadd.xlane.f32.xlu0 %v2057_v19 }
 0xa36   : > { %v3245_v21 = vpop.eup %3244 }
 0xa37   : > { %v2060_v22 = vsel %vm923_vm4, %v3245_v21, 0.0 }
 0xa38   : > { %2061 = vadd.xlane.f32.xlu1 %v2060_v22  ;;  %v3209_v22 = vld [vmem:[%s3974_s10 + $0x8] sm:$0xff]  }
 0xa3a   : > { %v3247_v23 = vpop.eup %3246 }
 0xa3b   : > { %v2063_v25 = vsel %vm923_vm4, %v3247_v23, 0.0 }
 0xa3c   : > { %2064 = vadd.xlane.f32.xlu0 %v2063_v25 }
 0xabd   : > { %v2056_v37 = vpop.xlane.xlu1 %2055 }
 0xabe   : > { %3248 = vrcp.f32 %v2056_v37  ;;  %v2059_v38 = vpop.xlane.xlu0 %2058 }
 0xabf   : > { %3250 = vrcp.f32 %v2059_v38 }
 0xac5   : > { %v2062_v39 = vpop.xlane.xlu1 %2061 }
 0xac6   : > { %3252 = vrcp.f32 %v2062_v39 }
 0xac8   : > { %v3249_v40 = vpop.eup %3248 }
 0xac9   : > { %v3251_v41 = vpop.eup %3250  ;;  %v2070_v24 = vmul.f32 %v3249_v40, %v3241_v15  ;;  %v2065_v42 = vpop.xlane.xlu0 %2064 }
 0xaca   : > { %v2071_v43 = vmul.f32 %v3251_v41, %v3243_v17  ;;  %3254 = vrcp.f32 %v2065_v42 }
 0xacb   : > { %v2074_v44 = vpack.c.bf16 %v2070_v24, %v2070_v24 }
 0xacc   : > { %v2075_v45 = vpack.c.bf16 %v2071_v43, %v2071_v43 }
 0xacd   : > { %3064 = vmatmul.mubr.msk.bf16.vlgmr.msra.gmra.mrb[28].mxu1 %vm923_vm4, %v2074_v44 }
 0xace   : > { %3070 = vmatmul.mubr.msk.bf16.vlgmr.msra.gmra.mrb[32].mxu0 %vm923_vm4, %v2075_v45  ;;  %3074 = vmatpush3.bf16.msra.mxu1 %v2175_v32 }
 0xacf   : > { %3080 = vmatpush3.bf16.msra.mxu0 %v2221_v36  ;;  %3075 = vmatprep.mubr.msk.bf16.mxu1 %vm3358_vm1, %v3357_v5 }
 0xad0   : > { %v3253_v46 = vpop.eup %3252  ;;  %3081 = vmatprep.mubr.msk.bf16.mxu0 %vm3358_vm1, %v3357_v5  ;;  %3085 = vmatprep.subr.bf16.mxu1 %v3357_v5 }
 0xad1   : > { %v2072_v47 = vmul.f32 %v3253_v46, %v3245_v21  ;;  %3093 = vmatprep.subr.bf16.mxu0 %v3357_v5 }
 0xad3   : > { %v2076_v48 = vpack.c.bf16 %v2072_v47, %v2072_v47 }
 0xad4   : > { %v3255_v49 = vpop.eup %3254 }
 0xad5   : > { %v2073_v50 = vmul.f32 %v3255_v49, %v3247_v23  ;;  %3076 = vmatmul.mubr.msk.bf16.vlgmr.msra.gmra.mrb[32].mxu1 %vm923_vm4, %v2076_v48 }
 0xad6   : > { %3089 = vmatprep.mubr.msk.bf16.mxu1 %vm3358_vm1, %v3357_v5  ;;  %3086 = vmatpush3.bf16.msra.mxu1 %v3208_v52 }
 0xad7   : > { %v2077_v51 = vpack.c.bf16 %v2073_v50, %v2073_v50  ;;  %3087 = vmatprep.subr.bf16.mxu1 %v3357_v5 }
 0xad9   : > { %3082 = vmatmul.mubr.msk.bf16.vlgmr.msra.gmra.mrb[36].mxu0 %vm923_vm4, %v2077_v51 }
 0xada   : > { %3097 = vmatprep.mubr.msk.bf16.mxu0 %vm3358_vm1, %v3357_v5  ;;  %3088 = vmatpush3.bf16.msra.mxu1 %v3209_v22 }
 0xadb   : > { %3101 = vmatprep.subr.bf16.mxu1 %v3357_v5 }
 0xba0   : > { %v2119_v53 = vpop.f32.mrb[28].mxu1 }
 0xba1   : > { %v2165_v55 = vpop.f32.mrb[32].mxu0  ;;  %v3065_v34 = vpop.f32.mrb[29].mxu1 }
 0xba2   : > { %v3071_v57 = vpop.f32.mrb[33].mxu0  ;;  %v2122_v58 = vpop.f32.mrb[30].mxu1  ;;  %v2421_v34 = vsub.s32 3, %v3553_v20 }
 0xba3   : > { %v2168_v59 = vpop.f32.mrb[34].mxu0  ;;  %v3066_v61 = vpop.f32.mrb[31].mxu1  ;;  %v3857_v57 = vld [vmem:[%s3977_s13] sm:$0xff] }
 0xba4   : > { %v3072_v62 = vpop.f32.mrb[35].mxu0  ;;  %v2422_v58 = vrot.slane %v3857_v57, %v2421_v34 }
 0xba8   : > { %v2211_v1 = vpop.f32.mrb[32].mxu1 }
 0xba9   : > { %v2263_v2 = vcombine.low %v2119_v53, %v2211_v1  ;;  %v2264_v3 = vcombine.high %v2119_v53, %v2211_v1  ;;  %v3077_v4 = vpop.f32.mrb[33].mxu1 }
 0xbaa   : > { %v2214_v6 = vpop.f32.mrb[34].mxu1 }
 0xbab   : > { %v3078_v0 = vpop.f32.mrb[35].mxu1  ;;  %v2271_v12 = vrot.slane %v2263_v2, %v3594_v54  ;;  %v2278_v13 = vrot.slane %v2264_v3, %v3594_v54 }
 0xbac   : > { %v2257_v7 = vpop.f32.mrb[36].mxu0 }
 0xbad   : > { %v2279_v8 = vcombine.low %v2165_v55, %v2257_v7  ;;  %v2280_v9 = vcombine.high %v2165_v55, %v2257_v7  ;;  %v3083_v10 = vpop.f32.mrb[37].mxu0  ;;  %v3210_v7 = vld [vmem:[%s3975_s11] sm:$0xff]  }
 0xbae   : > { %v2260_v11 = vpop.f32.mrb[38].mxu0  ;;  %3094 = vmatpush3.bf16.msra.mxu0 %v3210_v7 }
 0xbaf   : > { %v2287_v14 = vrot.slane %v2279_v8, %v3594_v54  ;;  %v2294_v15 = vrot.slane %v2280_v9, %v3594_v54  ;;  %v3084_v16 = vpop.f32.mrb[39].mxu0  ;;  %3095 = vmatprep.subr.bf16.mxu0 %v3357_v5  ;;  %v3212_v8 = vld [vmem:[%s3976_s12] sm:$0xff]   ;;  %v3213_v9 = vld [vmem:[%s3976_s12 + $0x8] sm:$0xff]  }
 0xbb1   : > { %v2295_v17 = vcombine.low %v2271_v12, %v2287_v14  ;;  %v2296_v18 = vcombine.high %v2271_v12, %v2287_v14  ;;  %v2311_v19 = vcombine.low %v2278_v13, %v2294_v15  ;;  %v2312_v21 = vcombine.high %v2278_v13, %v2294_v15 }
 0xbb3   : > { %v2303_v23 = vrot.slane %v2295_v17, %v3597_v60  ;;  %v2310_v25 = vrot.slane %v2296_v18, %v3597_v60  ;;  %v2319_v27 = vrot.slane %v2311_v19, %v3597_v60  ;;  %v2326_v28 = vrot.slane %v2312_v21, %v3597_v60 }
 0xbb5   : > { %v2331_v29 = vcombine.low %v2303_v23, %v2310_v25  ;;  %v2890_v30 = vcombine.high %v2303_v23, %v2310_v25  ;;  %v2347_v31 = vcombine.low %v2319_v27, %v2326_v28  ;;  %v2891_v32 = vcombine.high %v2319_v27, %v2326_v28 }
 0xbb6   : > { %v2503_v27 = vrot.slane %v3724_v26, %v1527_v56  ;;  %v3215_v56 = vld [vmem:[%s3976_s12 + $0x18] sm:$0xff]  }
 0xbb7   : > { %v2338_v35 = vrot.slane %v2331_v29, %v3594_v54  ;;  %v2346_v36 = vrot.slane %v2890_v30, %v3594_v54  ;;  %v2354_v37 = vrot.slane %v2347_v31, %v3594_v54  ;;  %v2362_v38 = vrot.slane %v2891_v32, %v3594_v54 }
 0xbb8   : > { %v2511_v29 = vrot.slane %v3724_v26, %v1634_v33  ;;  %v2895_v26 = vld [vmem:[%s4001_s26] ss:$0 sm:$0xff]  ;;  %s3910_s26 = scalar_lea.hbm %s4002_s15, %s2906_s30 }
 0xbb9   : > { %v2364_v39 = vcombine.high %v2338_v35, %v2346_v36  ;;  %v2380_v40 = vcombine.high %v2354_v37, %v2362_v38  ;;  %v2363_v41 = vcombine.low %v2338_v35, %v2346_v36  ;;  %v2379_v24 = vcombine.low %v2354_v37, %v2362_v38  ;;  %v3214_v37 = vld [vmem:[%s3976_s12 + $0x10] sm:$0xff]  }
 0xbbb   : > { %v2378_v42 = vrot.slane %v2364_v39, %v3597_v60  ;;  %v2394_v43 = vrot.slane %v2380_v40, %v3597_v60  ;;  %v2371_v44 = vrot.slane %v2363_v41, %v3597_v60  ;;  %v2387_v45 = vrot.slane %v2379_v24, %v3597_v60 }
 0xbbd   : > { %v2397_v46 = vcombine.low %v2378_v42, %v2394_v43  ;;  %v2396_v47 = vcombine.high %v2371_v44, %v2387_v45  ;;  %v2398_v48 = vcombine.high %v2378_v42, %v2394_v43  ;;  %v2395_v49 = vcombine.low %v2371_v44, %v2387_v45 }
 0xbbf   : > { %2404 = vrot.lane.b32.xlu0 %v2397_v46, %s3364_s7  ;;  %2400 = vrot.lane.b32.xlu1 %v2396_v47, %s3365_s23  ;;  %s603_s7 = scalar_lea.vmem [#allocation2], %s2838_s27  ;;  %s3367_s27 = smov [#allocation2]  }
 0xbc0   : > { %s2680_s23 = sshll.u32 %s603_s7, 4  ;;  %s3265_s18 = sshll.u32 %s3367_s27, 4  ;;  %s3912_s23 = int_to_ptr.vmem [resolvable:$true] %s2680_s23  ;;  %s3266_s18 = int_to_ptr.vmem [resolvable:$false] %s3265_s18 }
 0xbc1   : > { %s3261_s22 = scalar_lea.vmem %s3912_s23, 128  ;;  %s3267_s0 = scalar_lea.vmem %s3266_s18, 256 }
 0xbc2   : > { %p3262_p0 = scmp.ne.s32.totalorder %s3912_s23, %s3261_s22  ;;  %p3268_p4 = scmp.lt.s32.totalorder %s3912_s23, %s3266_s18 }
 0xbc3   : > { %2408 = vrot.lane.b32.xlu1 %v2398_v48, %s3366_s17  ;;  %p3269_p5 = scmp.lt.s32.totalorder %s3267_s0, %s3261_s22 }
 0xbc4   : > { %p3263_p1 = pnand %p3262_p0, %p3499_p3 }
 0xbc5   : > { %p3270_p6 = por %p3269_p5, %p3268_p4 }
 0xbc6   : > { %p3264_p2 = pneg %p3263_p1 }
 0xbc8   : > { %p3271_p7 = pnand %p3270_p6, %p3264_p2 }
 0xc31   : > { %v2401_v54 = vpop.permute.xlu1 %2400  ;;  %v2405_v50 = vpop.permute.xlu0 %2404 }
 0xc32   : > { %v2411_v51 = vsel %vm923_vm4, %v2395_v49, %v2401_v54 }
 0xc33   : > { %v2412_v53 = vsel %vm1123_vm5, %v2411_v51, %v2405_v50 }
 0xc35   : > { %v2409_v52 = vpop.permute.xlu1 %2408 }
 0xc36   : > { %v2413_v55 = vsel %vm1518_vm6, %v2412_v53, %v2409_v52 }
 0xc37   : > { %v2414_v60 = vpack.c.bf16 %v2413_v55, %v2413_v55 }
 0xc39   : > { %3090 = vmatmul.mubr.msk.bf16.vlgmr.msra.gmra.mrb[36].mxu1 %vm651_vm0, %v2414_v60 }
 0xc3a   : > { %3109 = vmatprep.mubr.msk.bf16.mxu1 %vm3358_vm1, %v3357_v5  ;;  %3102 = vmatpush3.bf16.msra.mxu1 %v3212_v8 }
 0xc3b   : > { %3103 = vmatprep.subr.bf16.mxu1 %v3357_v5 }
 0xc3e   : > { %3104 = vmatpush3.bf16.msra.mxu1 %v3213_v9 }
 0xc3f   : > { %3105 = vmatprep.subr.bf16.mxu1 %v3357_v5 }
 0xc42   : > { %3106 = vmatpush3.bf16.msra.mxu1 %v3214_v37 }
 0xc43   : > { %3107 = vmatprep.subr.bf16.mxu1 %v3357_v5  ;;  %v2592_v5 = vsub.s32 4, %v3553_v20 }
 0xc45   : > { %v2593_v43 = vrot.slane %v3857_v57, %v2592_v5 }
 0xc46   : > { %3108 = vmatpush3.bf16.msra.mxu1 %v3215_v56 }
 0xd0c   : > { %v2472_v59 = vpop.f32.mrb[36].mxu1 }
 0xd0d   : > { %v2473_v61 = vadd.f32 %v2472_v59, %v2422_v58  ;;  %v3091_v62 = vpop.f32.mrb[37].mxu1 }
 0xd0e   : > { %v2475_v1 = vpop.f32.mrb[38].mxu1 }
 0xd0f   : > { %v3861_v2 = vadd.f32 %v2473_v61, %v3703_v63  ;;  %v3092_v3 = vpop.f32.mrb[39].mxu1  ;;  %v3211_v63 = vld [vmem:[%s3975_s11 + $0x8] sm:$0xff]  }
 0xd10   : > { %3096 = vmatpush3.bf16.msra.mxu0 %v3211_v63 }
 0xd11   : > { %v2479_v4 = vsel %vm651_vm0, %v3861_v2, 0.0  ;;  %v2483_v6 = vmul.f32 %v3861_v2, %v3861_v2 }
 0xd12   : > { %2480 = vadd.xlane.f32.xlu1 %v2479_v4 }
 0xd13   : > { %v2484_v0 = vsel %vm651_vm0, %v2483_v6, 0.0 }
 0xd14   : > { %2485 = vadd.xlane.f32.xlu0 %v2484_v0 }
 0xd9f   : > { %v2481_v10 = vpop.xlane.xlu1 %2480 }
 0xda0   : > { %v2482_v11 = vmul.f32 0.03125, %v2481_v10 }
 0xda1   : > { %v2486_v12 = vpop.xlane.xlu0 %2485 }
 0xda2   : > { %v2488_v13 = vmul.f32 %v2482_v11, %v2482_v11  ;;  %v2487_v14 = vmul.f32 0.03125, %v2486_v12  ;;  %v2499_v28 = vsub.f32 %v3861_v2, %v2482_v11 }
 0xda4   : > { %v2489_v15 = vsub.f32 %v2487_v14, %v2488_v13  ;;  %v2504_v30 = vmul.f32 %v2503_v27, %v2499_v28 }
 0xda6   : > { %v2490_v16 = vmul.f32 1.032258, %v2489_v15 }
 0xda8   : > { %v2491_v17 = vmax.f32 %v2490_v16, 0.0 }
 0xdaa   : > { %3256 = vrsqrt.f32 %v2491_v17  ;;  %vm2494_vm10 = vcmp.eq.f32.partialorder %v2491_v17, inf  ;;  %v2497_v21 = vand.u32 2147483648, %v2491_v17  ;;  %vm2496_vm11 = vcmp.eq.f32.partialorder %v2491_v17, 0.0 }
 0xdb4   : > { %v3257_v18 = vpop.eup %3256 }
 0xdb5   : > { %v2493_v19 = vmul.f32 %v3257_v18, %v2491_v17 }
 0xdb7   : > { %v2495_v22 = vsel %vm2494_vm10, %v2491_v17, %v2493_v19 }
 0xdb8   : > { %v2498_v23 = vsel %vm2496_vm11, %v2497_v21, %v2495_v22 }
 0xdb9   : > { %v2505_v25 = vadd.f32 1e-06, %v2498_v23 }
 0xdbb   : > { %3258 = vrcp.f32 %v2505_v25 }
 0xdc5   : > { %v3259_v31 = vpop.eup %3258 }
 0xdc6   : > { %v2507_v32 = vmul.f32 %v3259_v31, %v2504_v30 }
 0xdc8   : > { %v2512_v35 = vadd.f32 %v2511_v29, %v2507_v32 }
 0xdca   : > { %v2513_v36 = vpack.c.bf16 %v2512_v35, %v2512_v35 }
 0xdcc   : > { %3098 = vmatmul.mubr.msk.bf16.vlgmr.msra.gmra.mrb[40].mxu0 %vm651_vm0, %v2513_v36 }
 0xe9f   : > { %v2574_v33 = vpop.f32.mrb[40].mxu0 }
 0xea0   : > { %v2575_v38 = vadd.f32 %v2895_v26, %v2574_v33  ;;  %v3099_v39 = vpop.f32.mrb[41].mxu0 }
 0xea1   : > { %v2577_v40 = vpop.f32.mrb[42].mxu0 }
 0xea2   : > { %v2580_v41 = vmax.f32 %v2575_v38, 0.0  ;;  %v3100_v24 = vpop.f32.mrb[43].mxu0 }
 0xea4   : > { %v2581_v42 = vpack.c.bf16 %v2580_v41, %v2580_v41 }
 0xea6   : > { %3110 = vmatmul.mubr.msk.bf16.vlgmr.msra.gmra.mrb[40].mxu1 %vm2618_vm12, %v2581_v42 }
 0xf79   : > { %v2656_v44 = vpop.f32.mrb[40].mxu1 }
 0xf7a   : > { %v2657_v45 = vadd.f32 %v2656_v44, %v2593_v43  ;;  %v3111_v46 = vpop.f32.mrb[41].mxu1 }
 0xf7b   : > { %v2659_v47 = vpop.f32.mrb[42].mxu1 }
 0xf7c   : > { %v2662_v48 = vadd.f32 %v2657_v45, %v3861_v2  ;;  %v3112_v49 = vpop.f32.mrb[43].mxu1 }
 0xf7e   : > { %2663 = vst.msk [vmem:[%s603_s7] sm:$0xff] %vm651_vm0, %v2662_v48 }
 0xf7f   : > { %3274 = shalt.err (!%p3271_p7)
}
 0xf80   : > { %s3275_s14 = scalar_lea.hbm %s3910_s26, 128  ;;  %s3279_s17 = scalar_lea.hbm %s4002_s15, 512 }
 0xf81   : > { %p3276_p9 = scmp.ne.s32.totalorder %s3910_s26, %s3275_s14  ;;  %p3280_p12 = scmp.lt.u32.totalorder %s3910_s26, %s4002_s15 }
 0xf82   : > { %p3281_p13 = scmp.lt.u32.totalorder %s3279_s17, %s3275_s14  ;;  %p3283_p1 = scmp.lt.u32.totalorder %s3275_s14, %s3910_s26 }
 0xf83   : > { %p3277_p10 = pnand %p3276_p9, %p3499_p3 }
 0xf84   : > { %p3282_p0 = por %p3281_p13, %p3280_p12 }
 0xf85   : > { %p3278_p11 = pneg %p3277_p10 }
 0xf86   : > { %p3284_p2 = por %p3283_p1, %p3282_p0 }
 0xf88   : > { %p3285_p4 = pnand %p3284_p2, %p3278_p11 }
 0xf8a   : > { %3288 = shalt.err (!%p3285_p4)
}
 0xf8b   : > { %3113 = dma.vmem_to_hbm [thread:$0]  (%p3499_p3), %s3912_s23, 128, %s3910_s26, %s2665_s21  }
 0xf8c PF: > { %s4003_s22 = sld [smem:[#allocation5_spill]]  ;;  %p3119_p5 = scmp.ge.s32.totalorder %s3355_s25, 2 }
 0xf8e   : > { %p3116_p6 = pnand %p3119_p5, %p3508_p8 }
 0xf92   : > { %s2692_s0 = sand.u32 1, %s4003_s22  }
 0xf93   : > { %s2693_s30 = scalar_lea.sflag [#allocation3], %s2692_s0 }
 0xf94   : > { %3322 = dma.done.wait (!%p3116_p6), %s2693_s30, 128  }
 0xf95   : > { %3324 = vsyncadd (!%p3116_p6), %s2693_s30, 4294967168  ;;  %s28_s25 = sadd.s32 1, %s3355_s25   ;;  %s4005_s21 = sld [smem:[#allocation6_spill]] }
 0xf96   : > { %p25_p7 = scmp.ge.s32.totalorder %s28_s25, 6   ;;  %s4006_s23 = sld [smem:[#allocation7_spill]] }
 0xf97   : > { %s4007_s16 = sld [smem:[#allocation8_spill]]  ;;  %s4008_s18 = smov %s3331_s19 }
 0xf98   : > { %s4009_s19 = smov %s3335_s20  ;;  %s4010_s20 = smov %s3517_s28 }
 0xf99   : > { %s4011_s22 = smov %s3351_s24  ;;  %27 = sbr.rel (!%p25_p7) target bundleno = 10 (0xa), region = 133 }
 0xf9d   : > { %s4012_s24 = smov %s4007_s16 }
 0xfa0   :  { %2698 = vsyncpa [#allocation3], 1 }
 0xfa1   :  { %2700 = vsyncpa [#allocation3 + $0x1], 1 }

</bundles_post_ra>
